<compile_context>
chip_gen: v5e
topology: v5e:2x2
jax: 0.10.0
libtpu: 0.0.40
codegen_flags: <defaults>
</compile_context>

<pallas_src>
import functools

import jax
import jax.numpy as jnp
from jax import lax
from jax.experimental import pallas as pl
from jax.experimental.pallas import tpu as pltpu

EPS = 1e-5

# ----------------------------- configuration -------------------------------
N, H, W = 2, 16, 16
IN_CHANNELS = 8
GROWTH = 8
BOTTLENECK = 4
GROUP_1X1 = 4          # only affects LearnedGroupConv's condensation bookkeeping
GROUP_3X3 = 4
CONDENSE_FACTOR = 4
DROPOUT_RATE = 0.0     # dropout is identity at inference / rate 0
C1 = BOTTLENECK * GROWTH            # bottleneck * growth = 32
COUT = GROWTH

LANE_PAD = 128         # zero-pad (in lanes) on each side of z in the scratch


# ------------------------------- fused kernel -------------------------------
def dense_layer_kernel(x_ref, p1_ref, w1_ref, t2_ref, w2_ref, o_ref,
                       zpad_ref, slab_ref, *, width):
    """A block of `bimg` images per grid step, everything in (C, H*W) layout."""
    bimg, cin, hw = x_ref.shape
    cout = o_ref.shape[1] - cin
    c1 = w1_ref.shape[0]

    # ---- hoisted per-call setup (exactly one grid step runs per core)
    s1 = p1_ref[0]                                   # (Cin, 1)  BN1 scale
    t1 = p1_ref[1]                                   # (Cin, 1)  BN1 shift
    w1 = w1_ref[...]                                 # (C1, Cin) 1x1 w (BN2 scale folded)
    t2 = t2_ref[...]                                 # (C1, 1)   BN2 shift
    w2 = w2_ref[...]                                 # (COUT, 9*C1) flattened 3x3 taps

    # W-border masks (neutralize flattened row-wrap), built once at (1, HW).
    col = lax.broadcasted_iota(jnp.int32, (1, hw), 1) % width
    mask_l = col >= 1              # left neighbour valid  (dx == 0)
    mask_r = col <= width - 2      # right neighbour valid (dx == 2)

    # Zero the pad lanes ONCE; per-image writes only ever touch the center,
    # so the pads stay zero for every image (H-border handling relies on it).
    zpad_ref[:, :, 0:LANE_PAD] = jnp.zeros((bimg, c1, LANE_PAD), jnp.float32)
    zpad_ref[:, :, LANE_PAD + hw:LANE_PAD + hw + LANE_PAD] = (
        jnp.zeros((bimg, c1, LANE_PAD), jnp.float32))

    # Static unroll over the images in this block; each image has its own
    # zpad / slab buffers so the scheduler can interleave them freely.
    for img in range(bimg):
        # ---- BN1 -> ReLU -> 1x1 conv (BN2 scale folded) -> +t2 -> ReLU
        xt = x_ref[img]                                    # (Cin, HW)
        y = jnp.maximum(xt * s1 + t1, 0.0)                 # BN1 + ReLU
        z = jnp.dot(w1, y, preferred_element_type=jnp.float32)   # (C1, HW)
        z = jnp.maximum(z + t2, 0.0)                       # BN2 shift + ReLU

        # ---- place z in the lane-padded scratch (zeros already on both sides)
        zpad_ref[img, :, LANE_PAD:LANE_PAD + hw] = z

        # ---- 3x3 conv: gather 9 lane-shifted taps into a (9*C1, HW) slab,
        #      then ONE (COUT, 9*C1) x (9*C1, HW) matmul.
        for dy in range(3):
            for dx in range(3):
                t = dy * 3 + dx
                off = (dy - 1) * width + (dx - 1)
                start = LANE_PAD + off
                tap = zpad_ref[img, :, start:start + hw]   # (C1, HW)
                if dx == 0:
                    tap = jnp.where(mask_l, tap, 0.0)
                elif dx == 2:
                    tap = jnp.where(mask_r, tap, 0.0)
                slab_ref[img, t * c1:(t + 1) * c1, :] = tap

        acc = jnp.dot(w2, slab_ref[img],
                      preferred_element_type=jnp.float32)  # (COUT, HW)

        # ---- concat([x, out], channel axis) via direct sub-block stores
        o_ref[img, 0:cin, :] = xt
        o_ref[img, cin:cin + cout, :] = acc


# ------------------------------- wrapper ------------------------------------
def _images_per_step(n):
    """1 image/step on v7x (2 TensorCores -> split across cores); fold the
    whole batch into one grid step on single-TC chips (v5e/v6e)."""
    try:
        kind = jax.devices()[0].device_kind.lower()
    except Exception:
        kind = ""
    return 1 if "v7" in kind else n


@functools.partial(jax.jit, static_argnames=("bimg",))
def _dense_layer_forward(x_nchw, p1, w1ts, t2c, w2f, *, bimg):
    n, cin, h, w = x_nchw.shape
    hw = h * w
    cout = w2f.shape[0]
    c1 = w1ts.shape[0]
    assert n % bimg == 0
    assert w + 1 <= LANE_PAD, "lane padding must cover the max tap offset"

    x_flat = x_nchw.reshape(n, cin, hw)                # free reshape (NCHW)
    kernel = functools.partial(dense_layer_kernel, width=w)

    out = pl.pallas_call(
        kernel,
        out_shape=jax.ShapeDtypeStruct((n, cin + cout, hw), jnp.float32),
        grid=(n // bimg,),
        in_specs=[
            pl.BlockSpec((bimg, cin, hw), lambda i: (i, 0, 0)),   # x block
            pl.BlockSpec((2, cin, 1), lambda i: (0, 0, 0)),       # BN1 scale/shift
            pl.BlockSpec((c1, cin), lambda i: (0, 0)),            # w1^T * s2
            pl.BlockSpec((c1, 1), lambda i: (0, 0)),              # BN2 shift
            pl.BlockSpec((cout, 9 * c1), lambda i: (0, 0)),       # flattened 3x3 taps
        ],
        out_specs=pl.BlockSpec((bimg, cin + cout, hw), lambda i: (i, 0, 0)),
        scratch_shapes=[
            pltpu.VMEM((bimg, c1, hw + 2 * LANE_PAD), jnp.float32),  # padded z
            pltpu.VMEM((bimg, 9 * c1, hw), jnp.float32),             # tap slab
        ],
        compiler_params=pltpu.CompilerParams(
            dimension_semantics=("parallel",)),
    )(x_flat, p1, w1ts, t2c, w2f)
    return out.reshape(n, cin + cout, h, w)


def dense_layer_forward(x_nchw, p1, w1ts, t2c, w2f):
    return _dense_layer_forward(x_nchw, p1, w1ts, t2c, w2f,
                                bimg=_images_per_step(x_nchw.shape[0]))


# ------------------------- parameter initialization -------------------------
def init_params(key):
    """Torch-style parameters (NCHW / OIHW)."""
    ks = jax.random.split(key, 10)
    g1 = jax.random.uniform(ks[0], (IN_CHANNELS,), jnp.float32, 0.5, 1.5)
    b1 = 0.1 * jax.random.normal(ks[1], (IN_CHANNELS,), jnp.float32)
    m1 = 0.1 * jax.random.normal(ks[2], (IN_CHANNELS,), jnp.float32)
    v1 = jax.random.uniform(ks[3], (IN_CHANNELS,), jnp.float32, 0.5, 1.5)
    # 1x1 conv weight, torch shape (C1, Cin, 1, 1); LearnedGroupConv mask == ones
    w1 = (jax.random.normal(ks[4], (C1, IN_CHANNELS, 1, 1), jnp.float32)
          / jnp.sqrt(IN_CHANNELS))
    g2 = jax.random.uniform(ks[5], (C1,), jnp.float32, 0.5, 1.5)
    b2 = 0.1 * jax.random.normal(ks[6], (C1,), jnp.float32)
    m2 = 0.1 * jax.random.normal(ks[7], (C1,), jnp.float32)
    v2 = jax.random.uniform(ks[8], (C1,), jnp.float32, 0.5, 1.5)
    # grouped 3x3 conv weight, torch shape (COUT, C1 // G, 3, 3)
    cg_in = C1 // GROUP_3X3
    w2 = (jax.random.normal(ks[9], (COUT, cg_in, 3, 3), jnp.float32)
          / jnp.sqrt(9.0 * cg_in))
    return dict(bn1=(g1, b1, m1, v1), w1=w1, bn2=(g2, b2, m2, v2), w2=w2)


def pack_params(p):
    """Precompute BN scale/shift, fold BN2 scale into w1, flatten 3x3 taps."""
    g1, b1, m1, v1 = p["bn1"]
    g2, b2, m2, v2 = p["bn2"]
    s1 = g1 * lax.rsqrt(v1 + EPS)
    t1 = b1 - m1 * s1
    s2 = g2 * lax.rsqrt(v2 + EPS)
    t2 = b2 - m2 * s2

    p1 = jnp.stack([s1, t1])[:, :, None]                       # (2, Cin, 1)
    w1ts = p["w1"][:, :, 0, 0] * s2[:, None]                   # (C1, Cin)
    t2c = t2[:, None]                                          # (C1, 1)

    # grouped 3x3 weight -> dense block-diagonal (COUT, C1, 3, 3).
    # Exact but 4x the MACs of the grouped op -- intentional TPU trade.
    cg_in, cg_out = C1 // GROUP_3X3, COUT // GROUP_3X3
    w2_dense = jnp.zeros((COUT, C1, 3, 3), jnp.float32)
    for g in range(GROUP_3X3):
        w2_dense = w2_dense.at[g * cg_out:(g + 1) * cg_out,
                               g * cg_in:(g + 1) * cg_in].set(
            p["w2"][g * cg_out:(g + 1) * cg_out])
    # Flatten taps along the contraction dim: column block t*C1:(t+1)*C1 is
    # the (COUT, C1) weight of tap t = dy*3 + dx (matches the kernel's slab).
    w2f = jnp.transpose(w2_dense, (0, 2, 3, 1)).reshape(COUT, 9 * C1)
    return p1, w1ts, t2c, w2f


# --------------------------- pure-JAX reference ------------------------------
def reference(x, params):
    g1, b1, m1, v1 = params["bn1"]
    g2, b2, m2, v2 = params["bn2"]

    def bn(v, g, b, m, var):
        return ((v - m[None, :, None, None])
                * lax.rsqrt(var + EPS)[None, :, None, None]
                * g[None, :, None, None] + b[None, :, None, None])

    y = jnp.maximum(bn(x, g1, b1, m1, v1), 0.0)
    z = lax.conv_general_dilated(
        y, params["w1"], (1, 1), "VALID",
        dimension_numbers=("NCHW", "OIHW", "NCHW"))
    z = jnp.maximum(bn(z, g2, b2, m2, v2), 0.0)
    out2 = lax.conv_general_dilated(
        z, params["w2"], (1, 1), ((1, 1), (1, 1)),
        feature_group_count=GROUP_3X3,
        dimension_numbers=("NCHW", "OIHW", "NCHW"))
    return jnp.concatenate([x, out2], axis=1)


if __name__ == "__main__":
    key = jax.random.PRNGKey(0)
    k_x, k_p = jax.random.split(key)
    # NCHW input, as in the PyTorch module
    x = jax.random.normal(k_x, (N, IN_CHANNELS, H, W), jnp.float32)
    params = init_params(k_p)
    packed = pack_params(params)

    out = jax.block_until_ready(dense_layer_forward(x, *packed))
    assert out.shape == (N, IN_CHANNELS + GROWTH, H, W), out.shape

    ref = reference(x, params)
    if not jnp.allclose(out, ref, rtol=1e-4, atol=1e-4):
        raise AssertionError(
            f"Pallas output does not match reference; max abs err "
            f"{jnp.max(jnp.abs(out - ref))}")

    # TODO(synk): LearnedGroupConv's training-time condensation/mask update and
    # dropout are training-only dynamics; inference (mask=ones, dropout off) is
    # reproduced here.
    print("KERNEL_OK")
</pallas_src>

<mosaic_0001>
module attributes {stable_mosaic.version = 11 : i64} {
  func.func @dense_layer_kernel(%arg0: i32, %arg1: memref<2x8x256xf32, #tpu.memory_space<vmem>>, %arg2: memref<2x8x1xf32, #tpu.memory_space<vmem>>, %arg3: memref<32x8xf32, #tpu.memory_space<vmem>>, %arg4: memref<32x1xf32, #tpu.memory_space<vmem>>, %arg5: memref<8x288xf32, #tpu.memory_space<vmem>>, %arg6: memref<2x16x256xf32, #tpu.memory_space<vmem>>, %arg7: memref<2x32x512xf32, #tpu.memory_space<vmem>>, %arg8: memref<2x288x256xf32, #tpu.memory_space<vmem>>) attributes {dimension_semantics = [#tpu.dimension_semantics<parallel>], iteration_bounds = array<i64: 1>, scalar_prefetch = 0 : i64, scratch_operands = 2 : i64, tpu.core_type = #tpu.core_type<tc>, window_params = [{transform_indices = @transform_0, window_bounds = array<i64: 2, 8, 256>}, {pipeline_mode = #tpu.pipeline_mode<synchronous>, transform_indices = @transform_1, window_bounds = array<i64: 2, 8, 1>}, {pipeline_mode = #tpu.pipeline_mode<synchronous>, transform_indices = @transform_2, window_bounds = array<i64: 32, 8>}, {pipeline_mode = #tpu.pipeline_mode<synchronous>, transform_indices = @transform_3, window_bounds = array<i64: 32, 1>}, {pipeline_mode = #tpu.pipeline_mode<synchronous>, transform_indices = @transform_4, window_bounds = array<i64: 8, 288>}, {transform_indices = @transform_5, window_bounds = array<i64: 2, 16, 256>}]} {
    %c0 = arith.constant 0 : index
    %c0_0 = arith.constant 0 : index
    %c0_1 = arith.constant 0 : index
    %0 = vector.load %arg2[%c0, %c0_0, %c0_1] : memref<2x8x1xf32, #tpu.memory_space<vmem>>, vector<1x8x1xf32>
    %1 = vector.shape_cast %0 : vector<1x8x1xf32> to vector<8x1xf32>
    %c1 = arith.constant 1 : index
    %c0_2 = arith.constant 0 : index
    %c0_3 = arith.constant 0 : index
    %2 = vector.load %arg2[%c1, %c0_2, %c0_3] : memref<2x8x1xf32, #tpu.memory_space<vmem>>, vector<1x8x1xf32>
    %3 = vector.shape_cast %2 : vector<1x8x1xf32> to vector<8x1xf32>
    %c0_4 = arith.constant 0 : index
    %c0_5 = arith.constant 0 : index
    %4 = vector.load %arg3[%c0_4, %c0_5] : memref<32x8xf32, #tpu.memory_space<vmem>>, vector<32x8xf32>
    %c0_6 = arith.constant 0 : index
    %c0_7 = arith.constant 0 : index
    %5 = vector.load %arg4[%c0_6, %c0_7] : memref<32x1xf32, #tpu.memory_space<vmem>>, vector<32x1xf32>
    %c0_8 = arith.constant 0 : index
    %c0_9 = arith.constant 0 : index
    %6 = vector.load %arg5[%c0_8, %c0_9] : memref<8x288xf32, #tpu.memory_space<vmem>>, vector<8x288xf32>
    %7 = tpu.iota {dimensions = array<i32: 1>} : vector<1x256xi32>
    %c16_i32 = arith.constant 16 : i32
    %c0_i32 = arith.constant 0 : i32
    %8 = arith.cmpi eq, %c16_i32, %c0_i32 : i32
    %c1_i32 = arith.constant 1 : i32
    %9 = arith.select %8, %c1_i32, %c16_i32 : i32
    %10 = vector.broadcast %9 : i32 to vector<1x256xi32>
    %11 = arith.remsi %7, %10 : vector<1x256xi32>
    %c0_i32_10 = arith.constant 0 : i32
    %12 = vector.broadcast %c0_i32_10 : i32 to vector<1x256xi32>
    %13 = arith.cmpi ne, %11, %12 : vector<1x256xi32>
    %c0_i32_11 = arith.constant 0 : i32
    %14 = vector.broadcast %c0_i32_11 : i32 to vector<1x256xi32>
    %15 = arith.cmpi slt, %11, %14 : vector<1x256xi32>
    %c0_i32_12 = arith.constant 0 : i32
    %16 = arith.cmpi slt, %9, %c0_i32_12 : i32
    %17 = vector.broadcast %16 : i1 to vector<1x256xi1>
    %18 = vector.broadcast %17 : vector<1x256xi1> to vector<1x256xi1>
    %19 = arith.xori %15, %18 : vector<1x256xi1>
    %20 = arith.andi %19, %13 : vector<1x256xi1>
    %21 = vector.broadcast %9 : i32 to vector<1x256xi32>
    %22 = arith.addi %11, %21 : vector<1x256xi32>
    %23 = arith.select %20, %22, %11 : vector<1x256xi1>, vector<1x256xi32>
    %c1_i32_13 = arith.constant 1 : i32
    %24 = vector.broadcast %c1_i32_13 : i32 to vector<1x256xi32>
    %25 = arith.cmpi sge, %23, %24 : vector<1x256xi32>
    %c14_i32 = arith.constant 14 : i32
    %26 = vector.broadcast %c14_i32 : i32 to vector<1x256xi32>
    %27 = arith.cmpi sle, %23, %26 : vector<1x256xi32>
    %cst = arith.constant 0.000000e+00 : f32
    %28 = vector.broadcast %cst : f32 to vector<2x32x128xf32>
    %c0_14 = arith.constant 0 : index
    %c0_15 = arith.constant 0 : index
    %c0_16 = arith.constant 0 : index
    %29 = vector.load %arg7[%c0_14, %c0_15, %c0_16] : memref<2x32x512xf32, #tpu.memory_space<vmem>>, vector<2x32x128xf32>
    tpu.vector_store %arg7[%c0_14, %c0_15, %c0_16], %28 {strides = array<i32>} : memref<2x32x512xf32, #tpu.memory_space<vmem>>, vector<2x32x128xf32>,
    %cst_17 = arith.constant 0.000000e+00 : f32
    %30 = vector.broadcast %cst_17 : f32 to vector<2x32x128xf32>
    %c0_18 = arith.constant 0 : index
    %c0_19 = arith.constant 0 : index
    %c384 = arith.constant 384 : index
    %31 = vector.load %arg7[%c0_18, %c0_19, %c384] : memref<2x32x512xf32, #tpu.memory_space<vmem>>, vector<2x32x128xf32>
    tpu.vector_store %arg7[%c0_18, %c0_19, %c384], %30 {strides = array<i32>} : memref<2x32x512xf32, #tpu.memory_space<vmem>>, vector<2x32x128xf32>,
    %c0_20 = arith.constant 0 : index
    %c0_21 = arith.constant 0 : index
    %c0_22 = arith.constant 0 : index
    %32 = vector.load %arg1[%c0_20, %c0_21, %c0_22] : memref<2x8x256xf32, #tpu.memory_space<vmem>>, vector<1x8x256xf32>
    %33 = vector.shape_cast %32 : vector<1x8x256xf32> to vector<8x256xf32>
    %34 = vector.broadcast %1 : vector<8x1xf32> to vector<8x256xf32>
    %35 = arith.mulf %33, %34 : vector<8x256xf32>
    %36 = vector.broadcast %3 : vector<8x1xf32> to vector<8x256xf32>
    %37 = arith.addf %35, %36 : vector<8x256xf32>
    %cst_23 = arith.constant 0.000000e+00 : f32
    %38 = vector.broadcast %cst_23 : f32 to vector<8x256xf32>
    %39 = arith.maximumf %37, %38 : vector<8x256xf32>
    %cst_24 = arith.constant dense<0.000000e+00> : vector<32x256xf32>
    %40 = tpu.matmul %4, %39, %cst_24 {dimension_numbers = #tpu.dot_dimension_numbers<[1], [0], [0], [1], [0, 0, 1, 1], [], []>} : vector<32x8xf32>, vector<8x256xf32>, vector<32x256xf32> -> vector<32x256xf32>
    %41 = vector.broadcast %5 : vector<32x1xf32> to vector<32x256xf32>
    %42 = arith.addf %40, %41 : vector<32x256xf32>
    %cst_25 = arith.constant 0.000000e+00 : f32
    %43 = vector.broadcast %cst_25 : f32 to vector<32x256xf32>
    %44 = arith.maximumf %42, %43 : vector<32x256xf32>
    %c0_26 = arith.constant 0 : index
    %c0_27 = arith.constant 0 : index
    %c128 = arith.constant 128 : index
    %45 = vector.load %arg7[%c0_26, %c0_27, %c128] : memref<2x32x512xf32, #tpu.memory_space<vmem>>, vector<1x32x256xf32>
    %46 = vector.shape_cast %45 : vector<1x32x256xf32> to vector<32x256xf32>
    %47 = vector.shape_cast %44 : vector<32x256xf32> to vector<1x32x256xf32>
    tpu.vector_store %arg7[%c0_26, %c0_27, %c128], %47 {strides = array<i32>} : memref<2x32x512xf32, #tpu.memory_space<vmem>>, vector<1x32x256xf32>,
    %c0_28 = arith.constant 0 : index
    %c0_29 = arith.constant 0 : index
    %c111 = arith.constant 111 : index
    %48 = vector.load %arg7[%c0_28, %c0_29, %c111] : memref<2x32x512xf32, #tpu.memory_space<vmem>>, vector<1x32x256xf32>
    %49 = vector.shape_cast %48 : vector<1x32x256xf32> to vector<32x256xf32>
    %cst_30 = arith.constant 0.000000e+00 : f32
    %50 = vector.shape_cast %25 : vector<1x256xi1> to vector<1x256xi1>
    %51 = vector.broadcast %50 : vector<1x256xi1> to vector<32x256xi1>
    %52 = vector.broadcast %cst_30 : f32 to vector<32x256xf32>
    %53 = arith.select %51, %49, %52 : vector<32x256xi1>, vector<32x256xf32>
    %c0_31 = arith.constant 0 : index
    %c0_32 = arith.constant 0 : index
    %c0_33 = arith.constant 0 : index
    %54 = vector.load %arg8[%c0_31, %c0_32, %c0_33] : memref<2x288x256xf32, #tpu.memory_space<vmem>>, vector<1x32x256xf32>
    %55 = vector.shape_cast %54 : vector<1x32x256xf32> to vector<32x256xf32>
    %56 = vector.shape_cast %53 : vector<32x256xf32> to vector<1x32x256xf32>
    tpu.vector_store %arg8[%c0_31, %c0_32, %c0_33], %56 {strides = array<i32>} : memref<2x288x256xf32, #tpu.memory_space<vmem>>, vector<1x32x256xf32>,
    %c0_34 = arith.constant 0 : index
    %c0_35 = arith.constant 0 : index
    %c112 = arith.constant 112 : index
    %57 = vector.load %arg7[%c0_34, %c0_35, %c112] : memref<2x32x512xf32, #tpu.memory_space<vmem>>, vector<1x32x256xf32>
    %58 = vector.shape_cast %57 : vector<1x32x256xf32> to vector<32x256xf32>
    %c0_36 = arith.constant 0 : index
    %c32 = arith.constant 32 : index
    %c0_37 = arith.constant 0 : index
    %59 = vector.load %arg8[%c0_36, %c32, %c0_37] : memref<2x288x256xf32, #tpu.memory_space<vmem>>, vector<1x32x256xf32>
    %60 = vector.shape_cast %59 : vector<1x32x256xf32> to vector<32x256xf32>
    %61 = vector.shape_cast %58 : vector<32x256xf32> to vector<1x32x256xf32>
    tpu.vector_store %arg8[%c0_36, %c32, %c0_37], %61 {strides = array<i32>} : memref<2x288x256xf32, #tpu.memory_space<vmem>>, vector<1x32x256xf32>,
    %c0_38 = arith.constant 0 : index
    %c0_39 = arith.constant 0 : index
    %c113 = arith.constant 113 : index
    %62 = vector.load %arg7[%c0_38, %c0_39, %c113] : memref<2x32x512xf32, #tpu.memory_space<vmem>>, vector<1x32x256xf32>
    %63 = vector.shape_cast %62 : vector<1x32x256xf32> to vector<32x256xf32>
    %cst_40 = arith.constant 0.000000e+00 : f32
    %64 = vector.shape_cast %27 : vector<1x256xi1> to vector<1x256xi1>
    %65 = vector.broadcast %64 : vector<1x256xi1> to vector<32x256xi1>
    %66 = vector.broadcast %cst_40 : f32 to vector<32x256xf32>
    %67 = arith.select %65, %63, %66 : vector<32x256xi1>, vector<32x256xf32>
    %c0_41 = arith.constant 0 : index
    %c64 = arith.constant 64 : index
    %c0_42 = arith.constant 0 : index
    %68 = vector.load %arg8[%c0_41, %c64, %c0_42] : memref<2x288x256xf32, #tpu.memory_space<vmem>>, vector<1x32x256xf32>
    %69 = vector.shape_cast %68 : vector<1x32x256xf32> to vector<32x256xf32>
    %70 = vector.shape_cast %67 : vector<32x256xf32> to vector<1x32x256xf32>
    tpu.vector_store %arg8[%c0_41, %c64, %c0_42], %70 {strides = array<i32>} : memref<2x288x256xf32, #tpu.memory_space<vmem>>, vector<1x32x256xf32>,
    %c0_43 = arith.constant 0 : index
    %c0_44 = arith.constant 0 : index
    %c127 = arith.constant 127 : index
    %71 = vector.load %arg7[%c0_43, %c0_44, %c127] : memref<2x32x512xf32, #tpu.memory_space<vmem>>, vector<1x32x256xf32>
    %72 = vector.shape_cast %71 : vector<1x32x256xf32> to vector<32x256xf32>
    %cst_45 = arith.constant 0.000000e+00 : f32
    %73 = vector.shape_cast %25 : vector<1x256xi1> to vector<1x256xi1>
    %74 = vector.broadcast %73 : vector<1x256xi1> to vector<32x256xi1>
    %75 = vector.broadcast %cst_45 : f32 to vector<32x256xf32>
    %76 = arith.select %74, %72, %75 : vector<32x256xi1>, vector<32x256xf32>
    %c0_46 = arith.constant 0 : index
    %c96 = arith.constant 96 : index
    %c0_47 = arith.constant 0 : index
    %77 = vector.load %arg8[%c0_46, %c96, %c0_47] : memref<2x288x256xf32, #tpu.memory_space<vmem>>, vector<1x32x256xf32>
    %78 = vector.shape_cast %77 : vector<1x32x256xf32> to vector<32x256xf32>
    %79 = vector.shape_cast %76 : vector<32x256xf32> to vector<1x32x256xf32>
    tpu.vector_store %arg8[%c0_46, %c96, %c0_47], %79 {strides = array<i32>} : memref<2x288x256xf32, #tpu.memory_space<vmem>>, vector<1x32x256xf32>,
    %c0_48 = arith.constant 0 : index
    %c0_49 = arith.constant 0 : index
    %c128_50 = arith.constant 128 : index
    %80 = vector.load %arg7[%c0_48, %c0_49, %c128_50] : memref<2x32x512xf32, #tpu.memory_space<vmem>>, vector<1x32x256xf32>
    %81 = vector.shape_cast %80 : vector<1x32x256xf32> to vector<32x256xf32>
    %c0_51 = arith.constant 0 : index
    %c128_52 = arith.constant 128 : index
    %c0_53 = arith.constant 0 : index
    %82 = vector.load %arg8[%c0_51, %c128_52, %c0_53] : memref<2x288x256xf32, #tpu.memory_space<vmem>>, vector<1x32x256xf32>
    %83 = vector.shape_cast %82 : vector<1x32x256xf32> to vector<32x256xf32>
    %84 = vector.shape_cast %81 : vector<32x256xf32> to vector<1x32x256xf32>
    tpu.vector_store %arg8[%c0_51, %c128_52, %c0_53], %84 {strides = array<i32>} : memref<2x288x256xf32, #tpu.memory_space<vmem>>, vector<1x32x256xf32>,
    %c0_54 = arith.constant 0 : index
    %c0_55 = arith.constant 0 : index
    %c129 = arith.constant 129 : index
    %85 = vector.load %arg7[%c0_54, %c0_55, %c129] : memref<2x32x512xf32, #tpu.memory_space<vmem>>, vector<1x32x256xf32>
    %86 = vector.shape_cast %85 : vector<1x32x256xf32> to vector<32x256xf32>
    %cst_56 = arith.constant 0.000000e+00 : f32
    %87 = vector.shape_cast %27 : vector<1x256xi1> to vector<1x256xi1>
    %88 = vector.broadcast %87 : vector<1x256xi1> to vector<32x256xi1>
    %89 = vector.broadcast %cst_56 : f32 to vector<32x256xf32>
    %90 = arith.select %88, %86, %89 : vector<32x256xi1>, vector<32x256xf32>
    %c0_57 = arith.constant 0 : index
    %c160 = arith.constant 160 : index
    %c0_58 = arith.constant 0 : index
    %91 = vector.load %arg8[%c0_57, %c160, %c0_58] : memref<2x288x256xf32, #tpu.memory_space<vmem>>, vector<1x32x256xf32>
    %92 = vector.shape_cast %91 : vector<1x32x256xf32> to vector<32x256xf32>
    %93 = vector.shape_cast %90 : vector<32x256xf32> to vector<1x32x256xf32>
    tpu.vector_store %arg8[%c0_57, %c160, %c0_58], %93 {strides = array<i32>} : memref<2x288x256xf32, #tpu.memory_space<vmem>>, vector<1x32x256xf32>,
    %c0_59 = arith.constant 0 : index
    %c0_60 = arith.constant 0 : index
    %c143 = arith.constant 143 : index
    %94 = vector.load %arg7[%c0_59, %c0_60, %c143] : memref<2x32x512xf32, #tpu.memory_space<vmem>>, vector<1x32x256xf32>
    %95 = vector.shape_cast %94 : vector<1x32x256xf32> to vector<32x256xf32>
    %cst_61 = arith.constant 0.000000e+00 : f32
    %96 = vector.shape_cast %25 : vector<1x256xi1> to vector<1x256xi1>
    %97 = vector.broadcast %96 : vector<1x256xi1> to vector<32x256xi1>
    %98 = vector.broadcast %cst_61 : f32 to vector<32x256xf32>
    %99 = arith.select %97, %95, %98 : vector<32x256xi1>, vector<32x256xf32>
    %c0_62 = arith.constant 0 : index
    %c192 = arith.constant 192 : index
    %c0_63 = arith.constant 0 : index
    %100 = vector.load %arg8[%c0_62, %c192, %c0_63] : memref<2x288x256xf32, #tpu.memory_space<vmem>>, vector<1x32x256xf32>
    %101 = vector.shape_cast %100 : vector<1x32x256xf32> to vector<32x256xf32>
    %102 = vector.shape_cast %99 : vector<32x256xf32> to vector<1x32x256xf32>
    tpu.vector_store %arg8[%c0_62, %c192, %c0_63], %102 {strides = array<i32>} : memref<2x288x256xf32, #tpu.memory_space<vmem>>, vector<1x32x256xf32>,
    %c0_64 = arith.constant 0 : index
    %c0_65 = arith.constant 0 : index
    %c144 = arith.constant 144 : index
    %103 = vector.load %arg7[%c0_64, %c0_65, %c144] : memref<2x32x512xf32, #tpu.memory_space<vmem>>, vector<1x32x256xf32>
    %104 = vector.shape_cast %103 : vector<1x32x256xf32> to vector<32x256xf32>
    %c0_66 = arith.constant 0 : index
    %c224 = arith.constant 224 : index
    %c0_67 = arith.constant 0 : index
    %105 = vector.load %arg8[%c0_66, %c224, %c0_67] : memref<2x288x256xf32, #tpu.memory_space<vmem>>, vector<1x32x256xf32>
    %106 = vector.shape_cast %105 : vector<1x32x256xf32> to vector<32x256xf32>
    %107 = vector.shape_cast %104 : vector<32x256xf32> to vector<1x32x256xf32>
    tpu.vector_store %arg8[%c0_66, %c224, %c0_67], %107 {strides = array<i32>} : memref<2x288x256xf32, #tpu.memory_space<vmem>>, vector<1x32x256xf32>,
    %c0_68 = arith.constant 0 : index
    %c0_69 = arith.constant 0 : index
    %c145 = arith.constant 145 : index
    %108 = vector.load %arg7[%c0_68, %c0_69, %c145] : memref<2x32x512xf32, #tpu.memory_space<vmem>>, vector<1x32x256xf32>
    %109 = vector.shape_cast %108 : vector<1x32x256xf32> to vector<32x256xf32>
    %cst_70 = arith.constant 0.000000e+00 : f32
    %110 = vector.shape_cast %27 : vector<1x256xi1> to vector<1x256xi1>
    %111 = vector.broadcast %110 : vector<1x256xi1> to vector<32x256xi1>
    %112 = vector.broadcast %cst_70 : f32 to vector<32x256xf32>
    %113 = arith.select %111, %109, %112 : vector<32x256xi1>, vector<32x256xf32>
    %c0_71 = arith.constant 0 : index
    %c256 = arith.constant 256 : index
    %c0_72 = arith.constant 0 : index
    %114 = vector.load %arg8[%c0_71, %c256, %c0_72] : memref<2x288x256xf32, #tpu.memory_space<vmem>>, vector<1x32x256xf32>
    %115 = vector.shape_cast %114 : vector<1x32x256xf32> to vector<32x256xf32>
    %116 = vector.shape_cast %113 : vector<32x256xf32> to vector<1x32x256xf32>
    tpu.vector_store %arg8[%c0_71, %c256, %c0_72], %116 {strides = array<i32>} : memref<2x288x256xf32, #tpu.memory_space<vmem>>, vector<1x32x256xf32>,
    %c0_73 = arith.constant 0 : index
    %c0_74 = arith.constant 0 : index
    %c0_75 = arith.constant 0 : index
    %117 = vector.load %arg8[%c0_73, %c0_74, %c0_75] : memref<2x288x256xf32, #tpu.memory_space<vmem>>, vector<1x288x256xf32>
    %118 = vector.shape_cast %117 : vector<1x288x256xf32> to vector<288x256xf32>
    %cst_76 = arith.constant dense<0.000000e+00> : vector<8x256xf32>
    %119 = tpu.matmul %6, %118, %cst_76 {dimension_numbers = #tpu.dot_dimension_numbers<[1], [0], [0], [1], [0, 0, 1, 1], [], []>} : vector<8x288xf32>, vector<288x256xf32>, vector<8x256xf32> -> vector<8x256xf32>
    %c0_77 = arith.constant 0 : index
    %c0_78 = arith.constant 0 : index
    %c0_79 = arith.constant 0 : index
    %120 = vector.load %arg6[%c0_77, %c0_78, %c0_79] : memref<2x16x256xf32, #tpu.memory_space<vmem>>, vector<1x8x256xf32>
    %121 = vector.shape_cast %120 : vector<1x8x256xf32> to vector<8x256xf32>
    %122 = vector.shape_cast %33 : vector<8x256xf32> to vector<1x8x256xf32>
    tpu.vector_store %arg6[%c0_77, %c0_78, %c0_79], %122 {strides = array<i32>} : memref<2x16x256xf32, #tpu.memory_space<vmem>>, vector<1x8x256xf32>,
    %c0_80 = arith.constant 0 : index
    %c8 = arith.constant 8 : index
    %c0_81 = arith.constant 0 : index
    %123 = vector.load %arg6[%c0_80, %c8, %c0_81] : memref<2x16x256xf32, #tpu.memory_space<vmem>>, vector<1x8x256xf32>
    %124 = vector.shape_cast %123 : vector<1x8x256xf32> to vector<8x256xf32>
    %125 = vector.shape_cast %119 : vector<8x256xf32> to vector<1x8x256xf32>
    tpu.vector_store %arg6[%c0_80, %c8, %c0_81], %125 {strides = array<i32>} : memref<2x16x256xf32, #tpu.memory_space<vmem>>, vector<1x8x256xf32>,
    %c1_82 = arith.constant 1 : index
    %c0_83 = arith.constant 0 : index
    %c0_84 = arith.constant 0 : index
    %126 = vector.load %arg1[%c1_82, %c0_83, %c0_84] : memref<2x8x256xf32, #tpu.memory_space<vmem>>, vector<1x8x256xf32>
    %127 = vector.shape_cast %126 : vector<1x8x256xf32> to vector<8x256xf32>
    %128 = vector.broadcast %1 : vector<8x1xf32> to vector<8x256xf32>
    %129 = arith.mulf %127, %128 : vector<8x256xf32>
    %130 = vector.broadcast %3 : vector<8x1xf32> to vector<8x256xf32>
    %131 = arith.addf %129, %130 : vector<8x256xf32>
    %cst_85 = arith.constant 0.000000e+00 : f32
    %132 = vector.broadcast %cst_85 : f32 to vector<8x256xf32>
    %133 = arith.maximumf %131, %132 : vector<8x256xf32>
    %cst_86 = arith.constant dense<0.000000e+00> : vector<32x256xf32>
    %134 = tpu.matmul %4, %133, %cst_86 {dimension_numbers = #tpu.dot_dimension_numbers<[1], [0], [0], [1], [0, 0, 1, 1], [], []>} : vector<32x8xf32>, vector<8x256xf32>, vector<32x256xf32> -> vector<32x256xf32>
    %135 = vector.broadcast %5 : vector<32x1xf32> to vector<32x256xf32>
    %136 = arith.addf %134, %135 : vector<32x256xf32>
    %cst_87 = arith.constant 0.000000e+00 : f32
    %137 = vector.broadcast %cst_87 : f32 to vector<32x256xf32>
    %138 = arith.maximumf %136, %137 : vector<32x256xf32>
    %c1_88 = arith.constant 1 : index
    %c0_89 = arith.constant 0 : index
    %c128_90 = arith.constant 128 : index
    %139 = vector.load %arg7[%c1_88, %c0_89, %c128_90] : memref<2x32x512xf32, #tpu.memory_space<vmem>>, vector<1x32x256xf32>
    %140 = vector.shape_cast %139 : vector<1x32x256xf32> to vector<32x256xf32>
    %141 = vector.shape_cast %138 : vector<32x256xf32> to vector<1x32x256xf32>
    tpu.vector_store %arg7[%c1_88, %c0_89, %c128_90], %141 {strides = array<i32>} : memref<2x32x512xf32, #tpu.memory_space<vmem>>, vector<1x32x256xf32>,
    %c1_91 = arith.constant 1 : index
    %c0_92 = arith.constant 0 : index
    %c111_93 = arith.constant 111 : index
    %142 = vector.load %arg7[%c1_91, %c0_92, %c111_93] : memref<2x32x512xf32, #tpu.memory_space<vmem>>, vector<1x32x256xf32>
    %143 = vector.shape_cast %142 : vector<1x32x256xf32> to vector<32x256xf32>
    %cst_94 = arith.constant 0.000000e+00 : f32
    %144 = vector.shape_cast %25 : vector<1x256xi1> to vector<1x256xi1>
    %145 = vector.broadcast %144 : vector<1x256xi1> to vector<32x256xi1>
    %146 = vector.broadcast %cst_94 : f32 to vector<32x256xf32>
    %147 = arith.select %145, %143, %146 : vector<32x256xi1>, vector<32x256xf32>
    %c1_95 = arith.constant 1 : index
    %c0_96 = arith.constant 0 : index
    %c0_97 = arith.constant 0 : index
    %148 = vector.load %arg8[%c1_95, %c0_96, %c0_97] : memref<2x288x256xf32, #tpu.memory_space<vmem>>, vector<1x32x256xf32>
    %149 = vector.shape_cast %148 : vector<1x32x256xf32> to vector<32x256xf32>
    %150 = vector.shape_cast %147 : vector<32x256xf32> to vector<1x32x256xf32>
    tpu.vector_store %arg8[%c1_95, %c0_96, %c0_97], %150 {strides = array<i32>} : memref<2x288x256xf32, #tpu.memory_space<vmem>>, vector<1x32x256xf32>,
    %c1_98 = arith.constant 1 : index
    %c0_99 = arith.constant 0 : index
    %c112_100 = arith.constant 112 : index
    %151 = vector.load %arg7[%c1_98, %c0_99, %c112_100] : memref<2x32x512xf32, #tpu.memory_space<vmem>>, vector<1x32x256xf32>
    %152 = vector.shape_cast %151 : vector<1x32x256xf32> to vector<32x256xf32>
    %c1_101 = arith.constant 1 : index
    %c32_102 = arith.constant 32 : index
    %c0_103 = arith.constant 0 : index
    %153 = vector.load %arg8[%c1_101, %c32_102, %c0_103] : memref<2x288x256xf32, #tpu.memory_space<vmem>>, vector<1x32x256xf32>
    %154 = vector.shape_cast %153 : vector<1x32x256xf32> to vector<32x256xf32>
    %155 = vector.shape_cast %152 : vector<32x256xf32> to vector<1x32x256xf32>
    tpu.vector_store %arg8[%c1_101, %c32_102, %c0_103], %155 {strides = array<i32>} : memref<2x288x256xf32, #tpu.memory_space<vmem>>, vector<1x32x256xf32>,
    %c1_104 = arith.constant 1 : index
    %c0_105 = arith.constant 0 : index
    %c113_106 = arith.constant 113 : index
    %156 = vector.load %arg7[%c1_104, %c0_105, %c113_106] : memref<2x32x512xf32, #tpu.memory_space<vmem>>, vector<1x32x256xf32>
    %157 = vector.shape_cast %156 : vector<1x32x256xf32> to vector<32x256xf32>
    %cst_107 = arith.constant 0.000000e+00 : f32
    %158 = vector.shape_cast %27 : vector<1x256xi1> to vector<1x256xi1>
    %159 = vector.broadcast %158 : vector<1x256xi1> to vector<32x256xi1>
    %160 = vector.broadcast %cst_107 : f32 to vector<32x256xf32>
    %161 = arith.select %159, %157, %160 : vector<32x256xi1>, vector<32x256xf32>
    %c1_108 = arith.constant 1 : index
    %c64_109 = arith.constant 64 : index
    %c0_110 = arith.constant 0 : index
    %162 = vector.load %arg8[%c1_108, %c64_109, %c0_110] : memref<2x288x256xf32, #tpu.memory_space<vmem>>, vector<1x32x256xf32>
    %163 = vector.shape_cast %162 : vector<1x32x256xf32> to vector<32x256xf32>
    %164 = vector.shape_cast %161 : vector<32x256xf32> to vector<1x32x256xf32>
    tpu.vector_store %arg8[%c1_108, %c64_109, %c0_110], %164 {strides = array<i32>} : memref<2x288x256xf32, #tpu.memory_space<vmem>>, vector<1x32x256xf32>,
    %c1_111 = arith.constant 1 : index
    %c0_112 = arith.constant 0 : index
    %c127_113 = arith.constant 127 : index
    %165 = vector.load %arg7[%c1_111, %c0_112, %c127_113] : memref<2x32x512xf32, #tpu.memory_space<vmem>>, vector<1x32x256xf32>
    %166 = vector.shape_cast %165 : vector<1x32x256xf32> to vector<32x256xf32>
    %cst_114 = arith.constant 0.000000e+00 : f32
    %167 = vector.shape_cast %25 : vector<1x256xi1> to vector<1x256xi1>
    %168 = vector.broadcast %167 : vector<1x256xi1> to vector<32x256xi1>
    %169 = vector.broadcast %cst_114 : f32 to vector<32x256xf32>
    %170 = arith.select %168, %166, %169 : vector<32x256xi1>, vector<32x256xf32>
    %c1_115 = arith.constant 1 : index
    %c96_116 = arith.constant 96 : index
    %c0_117 = arith.constant 0 : index
    %171 = vector.load %arg8[%c1_115, %c96_116, %c0_117] : memref<2x288x256xf32, #tpu.memory_space<vmem>>, vector<1x32x256xf32>
    %172 = vector.shape_cast %171 : vector<1x32x256xf32> to vector<32x256xf32>
    %173 = vector.shape_cast %170 : vector<32x256xf32> to vector<1x32x256xf32>
    tpu.vector_store %arg8[%c1_115, %c96_116, %c0_117], %173 {strides = array<i32>} : memref<2x288x256xf32, #tpu.memory_space<vmem>>, vector<1x32x256xf32>,
    %c1_118 = arith.constant 1 : index
    %c0_119 = arith.constant 0 : index
    %c128_120 = arith.constant 128 : index
    %174 = vector.load %arg7[%c1_118, %c0_119, %c128_120] : memref<2x32x512xf32, #tpu.memory_space<vmem>>, vector<1x32x256xf32>
    %175 = vector.shape_cast %174 : vector<1x32x256xf32> to vector<32x256xf32>
    %c1_121 = arith.constant 1 : index
    %c128_122 = arith.constant 128 : index
    %c0_123 = arith.constant 0 : index
    %176 = vector.load %arg8[%c1_121, %c128_122, %c0_123] : memref<2x288x256xf32, #tpu.memory_space<vmem>>, vector<1x32x256xf32>
    %177 = vector.shape_cast %176 : vector<1x32x256xf32> to vector<32x256xf32>
    %178 = vector.shape_cast %175 : vector<32x256xf32> to vector<1x32x256xf32>
    tpu.vector_store %arg8[%c1_121, %c128_122, %c0_123], %178 {strides = array<i32>} : memref<2x288x256xf32, #tpu.memory_space<vmem>>, vector<1x32x256xf32>,
    %c1_124 = arith.constant 1 : index
    %c0_125 = arith.constant 0 : index
    %c129_126 = arith.constant 129 : index
    %179 = vector.load %arg7[%c1_124, %c0_125, %c129_126] : memref<2x32x512xf32, #tpu.memory_space<vmem>>, vector<1x32x256xf32>
    %180 = vector.shape_cast %179 : vector<1x32x256xf32> to vector<32x256xf32>
    %cst_127 = arith.constant 0.000000e+00 : f32
    %181 = vector.shape_cast %27 : vector<1x256xi1> to vector<1x256xi1>
    %182 = vector.broadcast %181 : vector<1x256xi1> to vector<32x256xi1>
    %183 = vector.broadcast %cst_127 : f32 to vector<32x256xf32>
    %184 = arith.select %182, %180, %183 : vector<32x256xi1>, vector<32x256xf32>
    %c1_128 = arith.constant 1 : index
    %c160_129 = arith.constant 160 : index
    %c0_130 = arith.constant 0 : index
    %185 = vector.load %arg8[%c1_128, %c160_129, %c0_130] : memref<2x288x256xf32, #tpu.memory_space<vmem>>, vector<1x32x256xf32>
    %186 = vector.shape_cast %185 : vector<1x32x256xf32> to vector<32x256xf32>
    %187 = vector.shape_cast %184 : vector<32x256xf32> to vector<1x32x256xf32>
    tpu.vector_store %arg8[%c1_128, %c160_129, %c0_130], %187 {strides = array<i32>} : memref<2x288x256xf32, #tpu.memory_space<vmem>>, vector<1x32x256xf32>,
    %c1_131 = arith.constant 1 : index
    %c0_132 = arith.constant 0 : index
    %c143_133 = arith.constant 143 : index
    %188 = vector.load %arg7[%c1_131, %c0_132, %c143_133] : memref<2x32x512xf32, #tpu.memory_space<vmem>>, vector<1x32x256xf32>
    %189 = vector.shape_cast %188 : vector<1x32x256xf32> to vector<32x256xf32>
    %cst_134 = arith.constant 0.000000e+00 : f32
    %190 = vector.shape_cast %25 : vector<1x256xi1> to vector<1x256xi1>
    %191 = vector.broadcast %190 : vector<1x256xi1> to vector<32x256xi1>
    %192 = vector.broadcast %cst_134 : f32 to vector<32x256xf32>
    %193 = arith.select %191, %189, %192 : vector<32x256xi1>, vector<32x256xf32>
    %c1_135 = arith.constant 1 : index
    %c192_136 = arith.constant 192 : index
    %c0_137 = arith.constant 0 : index
    %194 = vector.load %arg8[%c1_135, %c192_136, %c0_137] : memref<2x288x256xf32, #tpu.memory_space<vmem>>, vector<1x32x256xf32>
    %195 = vector.shape_cast %194 : vector<1x32x256xf32> to vector<32x256xf32>
    %196 = vector.shape_cast %193 : vector<32x256xf32> to vector<1x32x256xf32>
    tpu.vector_store %arg8[%c1_135, %c192_136, %c0_137], %196 {strides = array<i32>} : memref<2x288x256xf32, #tpu.memory_space<vmem>>, vector<1x32x256xf32>,
    %c1_138 = arith.constant 1 : index
    %c0_139 = arith.constant 0 : index
    %c144_140 = arith.constant 144 : index
    %197 = vector.load %arg7[%c1_138, %c0_139, %c144_140] : memref<2x32x512xf32, #tpu.memory_space<vmem>>, vector<1x32x256xf32>
    %198 = vector.shape_cast %197 : vector<1x32x256xf32> to vector<32x256xf32>
    %c1_141 = arith.constant 1 : index
    %c224_142 = arith.constant 224 : index
    %c0_143 = arith.constant 0 : index
    %199 = vector.load %arg8[%c1_141, %c224_142, %c0_143] : memref<2x288x256xf32, #tpu.memory_space<vmem>>, vector<1x32x256xf32>
    %200 = vector.shape_cast %199 : vector<1x32x256xf32> to vector<32x256xf32>
    %201 = vector.shape_cast %198 : vector<32x256xf32> to vector<1x32x256xf32>
    tpu.vector_store %arg8[%c1_141, %c224_142, %c0_143], %201 {strides = array<i32>} : memref<2x288x256xf32, #tpu.memory_space<vmem>>, vector<1x32x256xf32>,
    %c1_144 = arith.constant 1 : index
    %c0_145 = arith.constant 0 : index
    %c145_146 = arith.constant 145 : index
    %202 = vector.load %arg7[%c1_144, %c0_145, %c145_146] : memref<2x32x512xf32, #tpu.memory_space<vmem>>, vector<1x32x256xf32>
    %203 = vector.shape_cast %202 : vector<1x32x256xf32> to vector<32x256xf32>
    %cst_147 = arith.constant 0.000000e+00 : f32
    %204 = vector.shape_cast %27 : vector<1x256xi1> to vector<1x256xi1>
    %205 = vector.broadcast %204 : vector<1x256xi1> to vector<32x256xi1>
    %206 = vector.broadcast %cst_147 : f32 to vector<32x256xf32>
    %207 = arith.select %205, %203, %206 : vector<32x256xi1>, vector<32x256xf32>
    %c1_148 = arith.constant 1 : index
    %c256_149 = arith.constant 256 : index
    %c0_150 = arith.constant 0 : index
    %208 = vector.load %arg8[%c1_148, %c256_149, %c0_150] : memref<2x288x256xf32, #tpu.memory_space<vmem>>, vector<1x32x256xf32>
    %209 = vector.shape_cast %208 : vector<1x32x256xf32> to vector<32x256xf32>
    %210 = vector.shape_cast %207 : vector<32x256xf32> to vector<1x32x256xf32>
    tpu.vector_store %arg8[%c1_148, %c256_149, %c0_150], %210 {strides = array<i32>} : memref<2x288x256xf32, #tpu.memory_space<vmem>>, vector<1x32x256xf32>,
    %c1_151 = arith.constant 1 : index
    %c0_152 = arith.constant 0 : index
    %c0_153 = arith.constant 0 : index
    %211 = vector.load %arg8[%c1_151, %c0_152, %c0_153] : memref<2x288x256xf32, #tpu.memory_space<vmem>>, vector<1x288x256xf32>
    %212 = vector.shape_cast %211 : vector<1x288x256xf32> to vector<288x256xf32>
    %cst_154 = arith.constant dense<0.000000e+00> : vector<8x256xf32>
    %213 = tpu.matmul %6, %212, %cst_154 {dimension_numbers = #tpu.dot_dimension_numbers<[1], [0], [0], [1], [0, 0, 1, 1], [], []>} : vector<8x288xf32>, vector<288x256xf32>, vector<8x256xf32> -> vector<8x256xf32>
    %c1_155 = arith.constant 1 : index
    %c0_156 = arith.constant 0 : index
    %c0_157 = arith.constant 0 : index
    %214 = vector.load %arg6[%c1_155, %c0_156, %c0_157] : memref<2x16x256xf32, #tpu.memory_space<vmem>>, vector<1x8x256xf32>
    %215 = vector.shape_cast %214 : vector<1x8x256xf32> to vector<8x256xf32>
    %216 = vector.shape_cast %127 : vector<8x256xf32> to vector<1x8x256xf32>
    tpu.vector_store %arg6[%c1_155, %c0_156, %c0_157], %216 {strides = array<i32>} : memref<2x16x256xf32, #tpu.memory_space<vmem>>, vector<1x8x256xf32>,
    %c1_158 = arith.constant 1 : index
    %c8_159 = arith.constant 8 : index
    %c0_160 = arith.constant 0 : index
    %217 = vector.load %arg6[%c1_158, %c8_159, %c0_160] : memref<2x16x256xf32, #tpu.memory_space<vmem>>, vector<1x8x256xf32>
    %218 = vector.shape_cast %217 : vector<1x8x256xf32> to vector<8x256xf32>
    %219 = vector.shape_cast %213 : vector<8x256xf32> to vector<1x8x256xf32>
    tpu.vector_store %arg6[%c1_158, %c8_159, %c0_160], %219 {strides = array<i32>} : memref<2x16x256xf32, #tpu.memory_space<vmem>>, vector<1x8x256xf32>,
    return
  }
  func.func @transform_0(%arg0: i32) -> (i32, i32, i32) {
    %c0_i32 = arith.constant 0 : i32
    %c0_i32_0 = arith.constant 0 : i32
    %c0_i32_1 = arith.constant 0 : i32
    return %arg0, %c0_i32, %c0_i32_0 : i32, i32, i32
  }
  func.func @transform_1(%arg0: i32) -> (i32, i32, i32) {
    %c0_i32 = arith.constant 0 : i32
    %c0_i32_0 = arith.constant 0 : i32
    %c0_i32_1 = arith.constant 0 : i32
    %c0_i32_2 = arith.constant 0 : i32
    return %c0_i32, %c0_i32_0, %c0_i32_1 : i32, i32, i32
  }
  func.func @transform_2(%arg0: i32) -> (i32, i32) {
    %c0_i32 = arith.constant 0 : i32
    %c0_i32_0 = arith.constant 0 : i32
    %c0_i32_1 = arith.constant 0 : i32
    return %c0_i32, %c0_i32_0 : i32, i32
  }
  func.func @transform_3(%arg0: i32) -> (i32, i32) {
    %c0_i32 = arith.constant 0 : i32
    %c0_i32_0 = arith.constant 0 : i32
    %c0_i32_1 = arith.constant 0 : i32
    return %c0_i32, %c0_i32_0 : i32, i32
  }
  func.func @transform_4(%arg0: i32) -> (i32, i32) {
    %c0_i32 = arith.constant 0 : i32
    %c0_i32_0 = arith.constant 0 : i32
    %c0_i32_1 = arith.constant 0 : i32
    return %c0_i32, %c0_i32_0 : i32, i32
  }
  func.func @transform_5(%arg0: i32) -> (i32, i32, i32) {
    %c0_i32 = arith.constant 0 : i32
    %c0_i32_0 = arith.constant 0 : i32
    %c0_i32_1 = arith.constant 0 : i32
    return %arg0, %c0_i32, %c0_i32_0 : i32, i32, i32
  }
}

</mosaic_0001>

<bundles_post_ra>
// kernel: _dense_layer_forward.1
= control target key start
LH: loop header
LB: loop body
LE: loop exit
PB: predicated region body
PF: predicated region fallthrough
CT: control target
= control target key end

     0   :  { %v2364_v0 = vmov 0   ;;  %v3730_v16 = vmov 0.0   ;;  %vm119_vm0 = vcmask 64512   ;;  %s2367_s22 = smov 15   ;;  %s2368_s26 = smov 1   ;;  %vm416_vm1 = vcmask 121856   ;;  %s3709_s1 = inlined_call_operand.vmem [shape: f32[2,8,1], index: 1, kind: input, shape index: {}]   ;;  %s3710_s0 = inlined_call_operand.vmem [shape: f32[2,8,256], index: 0, kind: input, shape index: {}]   ;;  %s3711_s5 = inlined_call_operand.vmem [shape: f32[2,16,256], index: 5, kind: output, shape index: {}]   ;;  %s3712_s3 = inlined_call_operand.vmem [shape: f32[32,1], index: 3, kind: input, shape index: {}]   ;;  %s3713_s2 = inlined_call_operand.vmem [shape: f32[32,8], index: 2, kind: input, shape index: {}]   ;;  %s3714_s4 = inlined_call_operand.vmem [shape: f32[8,288], index: 4, kind: input, shape index: {}]  }
   0x1   :  { %2121 = vset.pattern.permute.xlu0 %v2364_v0  ;;  %v20_v1 = vld [vmem:[%s3709_s1] sm:$0xff]  ;;  %2122 = vset.pattern.permute.xlu1 %v2364_v0  ;;  %v1988_v2 = vld [vmem:[%s3709_s1 + $0x8] sm:$0xff]  ;;  %v2413_v3 = vld [vmem:[%s3710_s0 + $0x10] sm:$0xff]  ;;  %s2369_s29 = smov 127   ;;  %s2371_s1 = smov 111   ;;  %vm497_vm2 = vcmask 7168  }
   0x2   :  { %85 = vperm.xlu0 %2121, %v20_v1   ;;  %2123 = vset.pattern.permute.xlu2 %v2364_v0  ;;  %v2418_v4 = vld [vmem:[%s3710_s0 + $0x18] sm:$0xff]  ;;  %2011 = vst [vmem:[%s3711_s5 + $0x20] sm:$0xff] %v2413_v3  ;;  %v81_v5 = vld [vmem:[%s3710_s0] sm:$0xff]  ;;  %v82_v6 = vld [vmem:[%s3710_s0 + $0x8] sm:$0xff]  ;;  %s2366_s0 = smov 17   ;;  %s2372_s30 = smov 113  }
   0x3   :  { %2012 = vst [vmem:[%s3711_s5 + $0x28] sm:$0xff] %v2418_v4  ;;  %v27_v7 = vld [vmem:[%s3712_s3] sm:$0xff]  ;;  %v28_v8 = vld [vmem:[%s3712_s3 + $0x8] sm:$0xff]  ;;  %v29_v10 = vld [vmem:[%s3712_s3 + $0x10] sm:$0xff]  ;;  %vm594_vm3 = vcmask 1039360   ;;  %vm258_vm4 = vcmask 138240  }
   0x4   :  { %1058 = vst [vmem:[%s3711_s5] sm:$0xff] %v81_v5  ;;  %101 = vperm.xlu1 %2122, %v27_v7   ;;  %111 = vperm.xlu2 %2123, %v29_v10   ;;  %v2462_v19 = vld [vmem:[%s3713_s2] sm:$0xff]  ;;  %v30_v20 = vld [vmem:[%s3712_s3 + $0x18] sm:$0xff]  ;;  %v2476_v21 = vld [vmem:[%s3713_s2 + $0x8] sm:$0xff]  ;;  %s2373_s6 = smov 112   ;;  %vm339_vm5 = vcmask 130048   ;;  %vm829_vm10 = vcmask 908288  }
   0x5   :  { %1059 = vst [vmem:[%s3711_s5 + $0x8] sm:$0xff] %v82_v6  ;;  %v2487_v22 = vld [vmem:[%s3713_s2 + $0x10] sm:$0xff]  ;;  %v2498_v23 = vld [vmem:[%s3713_s2 + $0x18] sm:$0xff]  ;;  %s2370_s2 = smov 16   ;;  %vm934_vm11 = vcmask 261120   ;;  %vm756_vm12 = vcmask 916480  }
   0x6   :  { %vm675_vm13 = vcmask 924672  }
   0xa   :  { %92 = vperm.xlu0 %2121, %v1988_v2  }
   0xc   :  { %106 = vperm.xlu1 %2122, %v28_v8   ;;  %116 = vperm.xlu2 %2123, %v30_v20  }
  0x12   :  { %2125 = vrot.lane.b32.xlu0 %v3730_v16, %s2366_s0 }
  0x14   :  { %2130 = vrot.lane.b32.xlu2 %v3730_v16, %s2366_s0  ;;  %2135 = vrot.lane.b32.xlu1 %v3730_v16, %s2367_s22 }
  0x1a   :  { %2140 = vrot.lane.b32.xlu0 %v3730_v16, %s2367_s22 }
  0x1c   :  { %2145 = vrot.lane.b32.xlu2 %v3730_v16, %s2368_s26 }
  0x22   :  { %2150 = vrot.lane.b32.xlu0 %v3730_v16, %s2368_s26 }
  0x24   :  { %2155 = vrot.lane.b32.xlu2 %v3730_v16, %s2369_s29 }
  0x5e   :  { %v2549_v39 = vpop.permute.xlu2 %111 }
  0x5f   :  { %3758 = vst [vmem:[#allocation9_spill] sm:$0xff] %v2549_v39 }
  0x66   :  { %v2578_v49 = vpop.permute.xlu2 %116 }
  0x67   :  { %3762 = vst [vmem:[#allocation13_spill] sm:$0xff] %v2578_v49 }
  0x6e   :  { %v2588_v54 = vpop.permute.xlu2 %2130 }
  0x74   :  { %v2446_v9 = vpop.permute.xlu0 %85 }
  0x75   :  { %v88_v11 = vmul.f32 %v2446_v9, %v81_v5  ;;  %v89_v12 = vmul.f32 %v2446_v9, %v82_v6 }
  0x76   :  { %v2510_v24 = vpop.permute.xlu1 %101  ;;  %v2146_v59 = vpop.permute.xlu2 %2145 }
  0x77   :  { %3753 = vst [vmem:[#allocation4_spill] sm:$0xff] %v2510_v24 }
  0x7c   :  { %v2453_v13 = vpop.permute.xlu0 %92 }
  0x7d   :  { %v95_v14 = vadd.f32 %v2453_v13, %v88_v11  ;;  %v96_v15 = vadd.f32 %v2453_v13, %v89_v12 }
  0x7e   :  { %v2534_v33 = vpop.permute.xlu1 %106  ;;  %v2614_v60 = vpop.permute.xlu2 %2155 }
  0x7f   :  { %v97_v17 = vmax.f32 %v95_v14, 0.0  ;;  %v98_v18 = vmax.f32 %v96_v15, 0.0  ;;  %3756 = vst [vmem:[#allocation7_spill] sm:$0xff] %v2534_v33  ;;  %v2147_v14 = vunpack.i.l.bf16 %v2146_v59  ;;  %v2157_v15 = vunpack.i.l.bf16 %v2614_v60 }
  0x81   :  { %147 = vmatpush.msra.mxu2 %v97_v17  ;;  %176 = vmatpush.msra.mxu1 %v98_v18  ;;  %v2148_v17 = vunpack.i.h.bf16 %v2146_v59 }
  0x82   :  { %1989 = vmatmul.msk.f32.vlgmr.msra.gmra.mxu2 %vm119_vm0, %v2462_v19  ;;  %1993 = vmatmul.msk.f32.vlgmr.msra.gmra.mxu1 %vm119_vm0, %v2462_v19 }
  0x84   :  { %v2616_v61 = vpop.permute.xlu0 %2125 }
  0x86   :  { %v2634_v1 = vpop.permute.xlu1 %2135 }
  0x87   :  { %v2137_v2 = vunpack.i.l.bf16 %v2634_v1 }
  0x8a   :  { %1990 = vmatmul.msk.f32.gmra.mxu2 %vm119_vm0, %v2476_v21  ;;  %1994 = vmatmul.msk.f32.gmra.mxu1 %vm119_vm0, %v2476_v21 }
  0x8c   :  { %v2624_v63 = vpop.permute.xlu0 %2140 }
  0x92   :  { %1991 = vmatmul.msk.f32.gmra.mxu2 %vm119_vm0, %v2487_v22  ;;  %1995 = vmatmul.msk.f32.gmra.mxu1 %vm119_vm0, %v2487_v22 }
  0x94   :  { %v2641_v5 = vpop.permute.xlu0 %2150 }
  0x9a   :  { %1992 = vmatmul.msk.f32.gmra.mxu2 %vm119_vm0, %v2498_v23  ;;  %1996 = vmatmul.msk.f32.gmra.mxu1 %vm119_vm0, %v2498_v23 }
  0xff   :  { %v178_v25 = vpop.f32.mrf.mxu1 }
 0x100   :  { %v179_v26 = vadd.f32 %v178_v25, %v2510_v24 }
 0x102   :  { %v2513_v27 = vmax.f32 %v179_v26, 0.0 }
 0x104   :  { %3754 = vst [vmem:[#allocation5_spill] sm:$0xff] %v2513_v27  ;;  %477 = vrot.lane.b32.xlu1 %v2513_v27, %s2368_s26  ;;  %396 = vrot.lane.b32.xlu0 %v2513_v27, %s2367_s22  ;;  %v2159_v31 = vpack.i.bf16 0.0, %v2513_v27 }
 0x105   :  { %238 = vrot.lane.b32.xlu2 %v2513_v27, %s2366_s0  ;;  %v149_v28 = vpop.f32.mrf.mxu2 }
 0x106   :  { %v150_v29 = vadd.f32 %v149_v28, %v2510_v24 }
 0x107   :  { %v181_v32 = vpop.f32.mrf.mxu1 }
 0x108   :  { %v2522_v30 = vmax.f32 %v150_v29, 0.0  ;;  %v182_v34 = vadd.f32 %v181_v32, %v2534_v33  ;;  %v2127_v32 = vunpack.i.l.bf16 %v2616_v61 }
 0x10a   :  { %3755 = vst [vmem:[#allocation6_spill] sm:$0xff] %v2522_v30  ;;  %v2539_v35 = vmax.f32 %v182_v34, 0.0  ;;  %v2164_v36 = vpack.i.bf16 %v2522_v30, %v3730_v16 }
 0x10c   :  { %572 = vrot.lane.b32.xlu1 %v2513_v27, %s2369_s29  ;;  %475 = vrot.lane.b32.xlu0 %v2522_v30, %s2368_s26  ;;  %3757 = vst [vmem:[#allocation8_spill] sm:$0xff] %v2539_v35 }
 0x10d   :  { %2160 = vrot.lane.b32.xlu2 %v2159_v31, %s2370_s2  ;;  %v152_v37 = vpop.f32.mrf.mxu2 }
 0x10e   :  { %v153_v38 = vadd.f32 %v152_v37, %v2534_v33 }
 0x10f   :  { %v184_v40 = vpop.f32.mrf.mxu1 }
 0x110   :  { %v185_v41 = vadd.f32 %v184_v40, %v2549_v39  ;;  %v2552_v42 = vmax.f32 %v153_v38, 0.0 }
 0x112   :  { %3759 = vst [vmem:[#allocation10_spill] sm:$0xff] %v2552_v42  ;;  %v2560_v43 = vmax.f32 %v185_v41, 0.0  ;;  %v2169_v45 = vpack.i.bf16 %v2539_v35, %v2552_v42 }
 0x114   :  { %570 = vrot.lane.b32.xlu0 %v2522_v30, %s2369_s29  ;;  %236 = vrot.lane.b32.xlu1 %v2522_v30, %s2366_s0  ;;  %3760 = vst [vmem:[#allocation11_spill] sm:$0xff] %v2560_v43  ;;  %v2174_v44 = vpack.i.bf16 0.0, %v2560_v43 }
 0x115   :  { %394 = vrot.lane.b32.xlu2 %v2522_v30, %s2367_s22  ;;  %v155_v46 = vpop.f32.mrf.mxu2 }
 0x116   :  { %v156_v47 = vadd.f32 %v155_v46, %v2549_v39 }
 0x117   :  { %v187_v51 = vpop.f32.mrf.mxu1 }
 0x118   :  { %v2576_v48 = vmax.f32 %v156_v47, 0.0  ;;  %v188_v52 = vadd.f32 %v187_v51, %v2578_v49 }
 0x11a   :  { %3761 = vst [vmem:[#allocation12_spill] sm:$0xff] %v2576_v48  ;;  %v2179_v50 = vpack.i.bf16 %v2576_v48, %v3730_v16  ;;  %v2591_v56 = vmax.f32 %v188_v52, 0.0 }
 0x11c   :  { %483 = vrot.lane.b32.xlu0 %v2539_v35, %s2368_s26  ;;  %2165 = vrot.lane.b32.xlu1 %v2164_v36, %s2370_s2 }
 0x11d   :  { %402 = vrot.lane.b32.xlu2 %v2539_v35, %s2367_s22  ;;  %v158_v53 = vpop.f32.mrf.mxu2 }
 0x11e   :  { %v159_v55 = vadd.f32 %v158_v53, %v2578_v49 }
 0x120   :  { %v2599_v57 = vmax.f32 %v159_v55, 0.0  ;;  %v2128_v55 = vunpack.i.h.bf16 %v2616_v61 }
 0x122   :  { %3763 = vst [vmem:[#allocation14_spill] sm:$0xff] %v2599_v57  ;;  %v2184_v58 = vpack.i.bf16 %v2591_v56, %v2599_v57 }
 0x124   :  { %242 = vrot.lane.b32.xlu0 %v2552_v42, %s2366_s0  ;;  %244 = vrot.lane.b32.xlu1 %v2539_v35, %s2366_s0 }
 0x125   :  { %481 = vrot.lane.b32.xlu2 %v2552_v42, %s2368_s26 }
 0x12c   :  { %2170 = vrot.lane.b32.xlu0 %v2169_v45, %s2370_s2  ;;  %400 = vrot.lane.b32.xlu1 %v2552_v42, %s2367_s22 }
 0x12d   :  { %2175 = vrot.lane.b32.xlu2 %v2174_v44, %s2370_s2  ;;  %v2209_v44 = vpack.i.bf16 %v2552_v42, %v3730_v16 }
 0x134   :  { %576 = vrot.lane.b32.xlu0 %v2552_v42, %s2369_s29  ;;  %250 = vrot.lane.b32.xlu1 %v2560_v43, %s2366_s0 }
 0x135   :  { %408 = vrot.lane.b32.xlu2 %v2560_v43, %s2367_s22 }
 0x13c   :  { %248 = vrot.lane.b32.xlu0 %v2576_v48, %s2366_s0  ;;  %2180 = vrot.lane.b32.xlu1 %v2179_v50, %s2370_s2 }
 0x13d   :  { %489 = vrot.lane.b32.xlu2 %v2560_v43, %s2368_s26 }
 0x144   :  { %256 = vrot.lane.b32.xlu0 %v2591_v56, %s2366_s0  ;;  %406 = vrot.lane.b32.xlu1 %v2576_v48, %s2367_s22 }
 0x145   :  { %487 = vrot.lane.b32.xlu2 %v2576_v48, %s2368_s26 }
 0x14c   :  { %2185 = vrot.lane.b32.xlu0 %v2184_v58, %s2370_s2  ;;  %414 = vrot.lane.b32.xlu1 %v2591_v56, %s2367_s22 }
 0x14d   :  { %825 = vrot.lane.b32.xlu2 %v2591_v56, %s2371_s1 }
 0x154   :  { %412 = vrot.lane.b32.xlu0 %v2599_v57, %s2367_s22  ;;  %495 = vrot.lane.b32.xlu1 %v2591_v56, %s2368_s26 }
 0x155   :  { %254 = vrot.lane.b32.xlu2 %v2599_v57, %s2366_s0 }
 0x15c   :  { %817 = vrot.lane.b32.xlu0 %v2576_v48, %s2371_s1  ;;  %493 = vrot.lane.b32.xlu1 %v2599_v57, %s2368_s26 }
 0x15d   :  { %811 = vrot.lane.b32.xlu2 %v2552_v42, %s2371_s1 }
 0x15f   :  { %v239_v62 = vpop.permute.xlu2 %238 }
 0x164   :  { %813 = vrot.lane.b32.xlu0 %v2539_v35, %s2371_s1  ;;  %819 = vrot.lane.b32.xlu1 %v2560_v43, %s2371_s1 }
 0x165   :  { %807 = vrot.lane.b32.xlu2 %v2513_v27, %s2371_s1 }
 0x167   :  { %v2632_v0 = vpop.permute.xlu2 %2160 }
 0x168   :  { %v2162_v47 = vunpack.i.l.bf16 %v2632_v0 }
 0x16c   :  { %578 = vrot.lane.b32.xlu0 %v2539_v35, %s2369_s29  ;;  %805 = vrot.lane.b32.xlu1 %v2522_v30, %s2371_s1 }
 0x16d   :  { %584 = vrot.lane.b32.xlu2 %v2560_v43, %s2369_s29 }
 0x16f   :  { %v395_v6 = vpop.permute.xlu2 %394 }
 0x170   :  { %v2646_v7 = vsel %vm416_vm1, %v2137_v2, %v395_v6 }
 0x174   :  { %2190 = vrot.lane.b32.xlu0 %v3730_v16, %s2369_s29  ;;  %582 = vrot.lane.b32.xlu1 %v2576_v48, %s2369_s29 }
 0x175   :  { %590 = vrot.lane.b32.xlu2 %v2591_v56, %s2369_s29 }
 0x176   :  { %v478_v8 = vpop.permute.xlu1 %477  ;;  %v397_v10 = vpop.permute.xlu0 %396 }
 0x177   :  { %v2654_v11 = vpop.permute.xlu2 %402  ;;  %v2657_v12 = vsel %vm416_vm1, %v395_v6, %v397_v10  ;;  %v2204_v10 = vpack.i.bf16 %v2513_v27, %v2522_v30 }
 0x17c   :  { %651 = vrot.lane.b32.xlu0 %v2522_v30, %s2372_s30  ;;  %823 = vrot.lane.b32.xlu1 %v2599_v57, %s2371_s1  ;;  %v2289_v30 = vpack.i.bf16 %v2599_v57, %v3730_v16 }
 0x17d   :  { %2195 = vrot.lane.b32.xlu2 %v3730_v16, %s2372_s30 }
 0x17e   :  { %v573_v18 = vpop.permute.xlu1 %572  ;;  %v476_v20 = vpop.permute.xlu0 %475 }
 0x17f   :  { %v482_v25 = vpop.permute.xlu2 %481  ;;  %v2667_v26 = vsel %vm497_vm2, %v2147_v14, %v476_v20  ;;  %v2670_v28 = vsel %vm497_vm2, %v476_v20, %v478_v8  ;;  %v2673_v29 = vsel %vm594_vm3, %v573_v18, %v2157_v15  ;;  %v2214_v8 = vpack.i.bf16 0.0, %v2539_v35 }
 0x180   :  { %v2676_v31 = vsel %vm497_vm2, %v2148_v17, %v482_v25  ;;  %v2163_v15 = vunpack.i.h.bf16 %v2632_v0 }
 0x184   :  { %657 = vrot.lane.b32.xlu0 %v2552_v42, %s2372_s30  ;;  %653 = vrot.lane.b32.xlu1 %v2513_v27, %s2372_s30  ;;  %v2152_v27 = vunpack.i.l.bf16 %v2641_v5 }
 0x185   :  { %663 = vrot.lane.b32.xlu2 %v2576_v48, %s2372_s30 }
 0x186   :  { %v571_v34 = vpop.permute.xlu0 %570  ;;  %v237_v36 = vpop.permute.xlu1 %236 }
 0x187   :  { %v2685_v37 = vpop.permute.xlu2 %2175  ;;  %v2688_v38 = vsel %vm258_vm4, %v2127_v32, %v237_v36  ;;  %v2691_v40 = vsel %vm258_vm4, %v237_v36, %v239_v62  ;;  %v2694_v41 = vsel %vm594_vm3, %v571_v34, %v573_v18  ;;  %v2219_v32 = vpack.i.bf16 %v2560_v43, %v2576_v48 }
 0x18c   :  { %665 = vrot.lane.b32.xlu0 %v2560_v43, %s2372_s30  ;;  %659 = vrot.lane.b32.xlu1 %v2539_v35, %s2372_s30 }
 0x18d   :  { %2210 = vrot.lane.b32.xlu2 %v2209_v44, %s2373_s6 }
 0x18e   :  { %v484_v45 = vpop.permute.xlu0 %483  ;;  %v2703_v46 = vpop.permute.xlu1 %2165 }
 0x18f   :  { %v2706_v50 = vpop.permute.xlu2 %408  ;;  %v3715_v51 = vunpack.i.h.bf16 %v2703_v46  ;;  %v2710_v52 = vsel %vm497_vm2, %v482_v25, %v484_v45  ;;  %v2224_v25 = vpack.i.bf16 0.0, %v2591_v56 }
 0x191   :  { %v2715_v53 = vsel %vm339_vm5, %v3715_v51, %v2162_v47 }
 0x194   :  { %671 = vrot.lane.b32.xlu0 %v2591_v56, %s2372_s30  ;;  %2200 = vrot.lane.b32.xlu1 %v3730_v16, %s2372_s30 }
 0x195   :  { %2235 = vrot.lane.b32.xlu2 %v3730_v16, %s2371_s1 }
 0x196   :  { %v243_v58 = vpop.permute.xlu0 %242  ;;  %v245_v59 = vpop.permute.xlu1 %244 }
 0x197   :  { %v490_v62 = vpop.permute.xlu2 %489  ;;  %v2725_v2 = vsel %vm258_vm4, %v2128_v55, %v243_v58  ;;  %v2728_v6 = vsel %vm258_vm4, %v243_v58, %v245_v59 }
 0x19c   :  { %2215 = vrot.lane.b32.xlu0 %v2214_v8, %s2373_s6  ;;  %2205 = vrot.lane.b32.xlu1 %v2204_v10, %s2373_s6  ;;  %v34_v8 = vlaneseq }
 0x19d   :  { %2245 = vrot.lane.b32.xlu2 %v3730_v16, %s2366_s0 }
 0x19e   :  { %v2737_v61 = vpop.permute.xlu0 %2170  ;;  %v2739_v14 = vpop.permute.xlu1 %400 }
 0x19f   :  { %v3716_v17 = vunpack.i.l.bf16 %v2737_v61  ;;  %v488_v18 = vpop.permute.xlu2 %487 }
 0x1a1   :  { %v2746_v20 = vsel %vm339_vm5, %v2163_v15, %v3716_v17 }
 0x1a4   :  { %2225 = vrot.lane.b32.xlu0 %v2224_v25, %s2373_s6  ;;  %2220 = vrot.lane.b32.xlu1 %v2219_v32, %s2373_s6  ;;  %v35_v32 = vand.u32 127, %v34_v8 }
 0x1a5   :  { %2255 = vrot.lane.b32.xlu2 %v3730_v16, %s2368_s26 }
 0x1a6   :  { %v2755_v0 = vpop.permute.xlu0 %576  ;;  %v2757_v34 = vpop.permute.xlu1 %250  ;;  %v36_v51 = vadd.s32 128, %v35_v32  ;;  %v41_v33 = vand.u32 15, %v35_v32 }
 0x1a7   :  { %v2759_v36 = vpop.permute.xlu2 %825 }
 0x1a8   :  { %v48_v24 = vand.u32 15, %v36_v51  ;;  %vm2795_vm6 = vcmp.ge.s32.totalorder %v41_v33, 1  ;;  %v2153_v51 = vunpack.i.h.bf16 %v2641_v5  ;;  %vm2827_vm8 = vcmp.le.s32.totalorder %v41_v33, 14 }
 0x1a9   :  { %v2142_v33 = vunpack.i.l.bf16 %v2624_v63 }
 0x1aa   :  { %vm2799_vm7 = vcmp.ge.s32.totalorder %v48_v24, 1  ;;  %vm2831_vm9 = vcmp.le.s32.totalorder %v48_v24, 14 }
 0x1ac   :  { %2230 = vrot.lane.b32.xlu1 %v3730_v16, %s2371_s1 }
 0x1ad   :  { %2260 = vrot.lane.b32.xlu2 %v3730_v16, %s2368_s26 }
 0x1ae   :  { %v2765_v44 = vpop.permute.xlu0 %248  ;;  %v2767_v45 = vpop.permute.xlu1 %2180 }
 0x1af   :  { %v2769_v47 = vpop.permute.xlu2 %254 }
 0x1b4   :  { %2250 = vrot.lane.b32.xlu1 %v3730_v16, %s2367_s22 }
 0x1b5   :  { %2265 = vrot.lane.b32.xlu2 %v3730_v16, %s2367_s22 }
 0x1b6   :  { %v2775_v55 = vpop.permute.xlu0 %256  ;;  %v407_v58 = vpop.permute.xlu1 %406 }
 0x1b7   :  { %v2777_v59 = vpop.permute.xlu2 %811 }
 0x1bc   :  { %588 = vrot.lane.b32.xlu1 %v2599_v57, %s2369_s29 }
 0x1bd   :  { %2285 = vrot.lane.b32.xlu2 %v3730_v16, %s2369_s29 }
 0x1be   :  { %v2783_v10 = vpop.permute.xlu0 %2185  ;;  %v415_v15 = vpop.permute.xlu1 %414 }
 0x1bf   :  { %v2785_v25 = vpop.permute.xlu2 %807 }
 0x1c5   :  { %669 = vrot.lane.b32.xlu2 %v2599_v57, %s2372_s30  ;;  %v503_v57 = vsel %vm497_vm2, %v488_v18, %v490_v62 }
 0x1c6   :  { %v413_v17 = vpop.permute.xlu0 %412  ;;  %v496_v49 = vpop.permute.xlu1 %495 }
 0x1c7   :  { %v2789_v39 = vpop.permute.xlu2 %584  ;;  %v424_v5 = vsel %vm416_vm1, %v413_v17, %v415_v15  ;;  %v2173_v15 = vunpack.i.h.bf16 %v2737_v61 }
 0x1cd   :  { %2290 = vrot.lane.b32.xlu2 %v2289_v30, %s2373_s6  ;;  %v502_v30 = vsel %vm497_vm2, %v2153_v51, %v488_v18  ;;  %v2183_v18 = vunpack.i.h.bf16 %v2767_v45 }
 0x1ce   :  { %v2803_v35 = vpop.permute.xlu0 %817  ;;  %v494_v48 = vpop.permute.xlu1 %493 }
 0x1cf   :  { %v2806_v32 = vpop.permute.xlu2 %590  ;;  %v504_v16 = vsel %vm497_vm2, %v2152_v27, %v494_v48  ;;  %v505_v43 = vsel %vm497_vm2, %v494_v48, %v496_v49 }
 0x1d0   :  { %2015 = vmatpush.msk.msra.mxu0 %vm2795_vm6, %v504_v16  ;;  %2039 = vmatpush.msk.msrb.mxu1 %vm2799_vm7, %v505_v43  ;;  %v2143_v16 = vunpack.i.h.bf16 %v2624_v63  ;;  %v2188_v63 = vunpack.i.h.bf16 %v2783_v10 }
 0x1d2   :  { %2016 = vmatpush.msk.msra.mxu0 %vm2795_vm6, %v502_v30  ;;  %2040 = vmatpush.msk.msrb.mxu1 %vm2799_vm7, %v503_v57  ;;  %v423_v24 = vsel %vm416_vm1, %v2143_v16, %v413_v17  ;;  %v2178_v17 = vunpack.i.h.bf16 %v2685_v37 }
 0x1d4   :  { %2017 = vmatpush.msk.msra.mxu0 %vm2795_vm6, %v2676_v31  ;;  %2041 = vmatpush.msk.msrb.mxu1 %vm2799_vm7, %v2710_v52  ;;  %v422_v31 = vsel %vm416_vm1, %v407_v58, %v2706_v50  ;;  %v2187_v52 = vunpack.i.l.bf16 %v2783_v10  ;;  %v2158_v50 = vunpack.i.h.bf16 %v2614_v60  ;;  %v2177_v10 = vunpack.i.l.bf16 %v2685_v37 }
 0x1d6   :  { %v2835_v48 = vpop.permute.xlu0 %813  ;;  %2018 = vmatpush.msk.msra.mxu0 %vm2795_vm6, %v2667_v26  ;;  %2042 = vmatpush.msk.msrb.mxu1 %vm2799_vm7, %v2670_v28  ;;  %v2843_v49 = vpop.permute.xlu1 %819  ;;  %v2138_v26 = vunpack.i.h.bf16 %v2634_v1  ;;  %v421_v28 = vsel %vm416_vm1, %v2142_v33, %v407_v58  ;;  %v420_v1 = vsel %vm416_vm1, %v2739_v14, %v2654_v11  ;;  %v2182_v58 = vunpack.i.l.bf16 %v2767_v45 }
 0x1d7   :  { %v2846_v57 = vpop.permute.xlu2 %2195  ;;  %v347_v45 = vsel %vm339_vm5, %v2187_v52, %v2188_v63  ;;  %v345_v16 = vsel %vm339_vm5, %v2183_v18, %v2177_v10  ;;  %v3772_v33 = vunpack.i.l.bf16 %v2737_v61 }
 0x1d8   :  { %2019 = vmatpush.msk.msra.mxu0 %vm2827_vm8, %v423_v24  ;;  %2043 = vmatpush.msk.msrb.mxu1 %vm2831_vm9, %v424_v5  ;;  %v419_v62 = vsel %vm416_vm1, %v2138_v26, %v2739_v14  ;;  %v346_v14 = vsel %vm339_vm5, %v2178_v17, %v2187_v52  ;;  %v3773_v5 = vunpack.i.h.bf16 %v2703_v46 }
 0x1d9   :  { %v343_v24 = vsel %vm339_vm5, %v3772_v33, %v2173_v15 }
 0x1da   :  { %2020 = vmatpush.msk.msra.mxu0 %vm2827_vm8, %v421_v28  ;;  %2044 = vmatpush.msk.msrb.mxu1 %vm2831_vm9, %v422_v31  ;;  %v2132_v28 = vunpack.i.l.bf16 %v2588_v54 }
 0x1dc   :  { %2021 = vmatpush.msk.msra.mxu0 %vm2827_vm8, %v419_v62  ;;  %2045 = vmatpush.msk.msrb.mxu1 %vm2831_vm9, %v420_v1  ;;  %v1066_v62 = vmul.f32 %v2418_v4, %v2446_v9  ;;  %v2954_v4 = vld [vmem:[%s3714_s4] sm:$0xff] }
 0x1de   :  { %v579_v51 = vpop.permute.xlu0 %578  ;;  %2022 = vmatpush.msk.msra.mxu0 %vm2827_vm8, %v2646_v7  ;;  %2046 = vmatpush.msk.msrb.mxu1 %vm2831_vm9, %v2657_v12  ;;  %v2885_v60 = vpop.permute.xlu1 %805  ;;  %v2167_v7 = vunpack.i.l.bf16 %v2703_v46  ;;  %v344_v12 = vsel %vm339_vm5, %v2182_v58, %v2183_v18  ;;  %v266_v46 = vsel %vm258_vm4, %v2769_v47, %v2775_v55  ;;  %v1068_v1 = vadd.f32 %v1066_v62, %v2453_v13 }
 0x1df   :  { %v2887_v11 = vpop.permute.xlu2 %663  ;;  %v2892_v37 = vsel %vm594_vm3, %v579_v51, %v2158_v50  ;;  %v2896_v30 = vsel %vm594_vm3, %v2755_v0, %v579_v51  ;;  %v2133_v0 = vunpack.i.h.bf16 %v2588_v54  ;;  %v1065_v50 = vmul.f32 %v2413_v3, %v2446_v9  ;;  %v2993_v9 = vld [vmem:[%s3714_s4 + $0x10] sm:$0xff] }
 0x1e0   :  { %946 = vmatpush.msra.mxu0 %v346_v14  ;;  %1006 = vmatpush.msrb.mxu1 %v347_v45  ;;  %v340_v26 = vsel %vm339_vm5, %v2167_v7, %v3773_v5  ;;  %v832_v3 = vsel %vm829_vm10, %v2777_v59, %v2835_v48 }
 0x1e2   :  { %947 = vmatpush.msra.mxu0 %v344_v12  ;;  %1007 = vmatpush.msrb.mxu1 %v345_v16 }
 0x1e4   :  { %948 = vmatpush.msra.mxu0 %v2746_v20  ;;  %1008 = vmatpush.msrb.mxu1 %v343_v24  ;;  %v265_v20 = vsel %vm258_vm4, %v2133_v0, %v2769_v47  ;;  %v264_v47 = vsel %vm258_vm4, %v2765_v44, %v2757_v34 }
 0x1e6   :  { %v2910_v31 = vpop.permute.xlu0 %2190  ;;  %v583_v63 = vpop.permute.xlu1 %582  ;;  %949 = vmatpush.msra.mxu0 %v340_v26  ;;  %1009 = vmatpush.msrb.mxu1 %v2715_v53  ;;  %v263_v53 = vsel %vm258_vm4, %v2132_v28, %v2765_v44 }
 0x1e7   :  { %v2192_v61 = vunpack.i.l.bf16 %v2910_v31  ;;  %v2914_v52 = vpop.permute.xlu2 %2210  ;;  %v2923_v54 = vsel %vm594_vm3, %v583_v63, %v2789_v39 }
 0x1e8   :  { %2023 = vmatpush.msk.msra.mxu0 %vm2795_vm6, %v265_v20  ;;  %2047 = vmatpush.msk.msrb.mxu1 %vm2799_vm7, %v266_v46 }
 0x1e9   :  { %v2938_v55 = vsel %vm594_vm3, %v2789_v39, %v2192_v61  ;;  %v1070_v39 = vmax.f32 %v1068_v1, 0.0 }
 0x1ea   :  { %2024 = vmatpush.msk.msra.mxu0 %vm2795_vm6, %v263_v53  ;;  %2048 = vmatpush.msk.msrb.mxu1 %vm2799_vm7, %v264_v47 }
 0x1ec   :  { %2025 = vmatpush.msk.msra.mxu0 %vm2795_vm6, %v2725_v2  ;;  %2049 = vmatpush.msk.msrb.mxu1 %vm2799_vm7, %v2728_v6 }
 0x1ee   :  { %v2956_v34 = vpop.permute.xlu0 %651  ;;  %v824_v44 = vpop.permute.xlu1 %823  ;;  %2026 = vmatpush.msk.msra.mxu0 %vm2795_vm6, %v2688_v38  ;;  %2050 = vmatpush.msk.msrb.mxu1 %vm2799_vm7, %v2691_v40  ;;  %v834_v38 = vsel %vm829_vm10, %v2803_v35, %v2843_v49  ;;  %v1067_v40 = vadd.f32 %v1065_v50, %v2453_v13  ;;  %v830_v13 = vsel %vm829_vm10, %v2885_v60, %v2785_v25 }
 0x1ef   :  { %v2964_v2 = vpop.permute.xlu2 %2235  ;;  %954 = vmatmul.f32.vlgmr.msra.gmra.mxu0 %v2954_v4  ;;  %1014 = vmatmul.f32.vlgmr.msrb.gmra.mxu1 %v2954_v4  ;;  %v836_v6 = vsel %vm829_vm10, %v824_v44, %v2759_v36  ;;  %v2212_v44 = vunpack.i.l.bf16 %v2914_v52 }
 0x1f0   :  { %v2237_v17 = vunpack.i.l.bf16 %v2964_v2  ;;  %1115 = vmatpush.msra.mxu1 %v1070_v39  ;;  %2035 = vmatpush.msk.msrb.mxu0 %vm2827_vm8, %v836_v6  ;;  %v1069_v35 = vmax.f32 %v1067_v40, 0.0  ;;  %v2213_v39 = vunpack.i.h.bf16 %v2914_v52  ;;  %v2198_v52 = vunpack.i.h.bf16 %v2846_v57 }
 0x1f2   :  { %2036 = vmatpush.msk.msrb.mxu0 %vm2827_vm8, %v834_v38  ;;  %v2983_v18 = vsel %vm829_vm10, %v2843_v49, %v2237_v17 }
 0x1f4   :  { %2037 = vmatpush.msk.msrb.mxu0 %vm2827_vm8, %v832_v3 }
 0x1f6   :  { %v2998_v49 = vpop.permute.xlu0 %657  ;;  %v3000_v58 = vpop.permute.xlu1 %653  ;;  %2038 = vmatpush.msk.msrb.mxu0 %vm2827_vm8, %v830_v13 }
 0x1f7   :  { %v3004_v59 = vpop.permute.xlu2 %2245  ;;  %1997 = vmatmul.msk.f32.vlgmr.msrb.gmra.mxu0 %vm934_vm11, %v2993_v9  ;;  %2005 = vmatmul.msk.f32.vlgmr.msra.gmra.mxu1 %vm119_vm0, %v2462_v19 }
 0x1f8   :  { %1086 = vmatpush.msra.mxu0 %v1069_v35 }
 0x1fe   :  { %v3010_v10 = vpop.permute.xlu0 %665  ;;  %v3012_v15 = vpop.permute.xlu1 %659 }
 0x1ff   :  { %v3014_v51 = vpop.permute.xlu2 %2255  ;;  %2001 = vmatmul.msk.f32.vlgmr.msra.gmra.mxu0 %vm119_vm0, %v2462_v19  ;;  %2006 = vmatmul.msk.f32.gmra.mxu1 %vm119_vm0, %v2476_v21 }
 0x206   :  { %v672_v60 = vpop.permute.xlu0 %671  ;;  %v2201_v14 = vpop.permute.xlu1 %2200 }
 0x207   :  { %v3020_v45 = vpop.permute.xlu2 %2260  ;;  %2002 = vmatmul.msk.f32.gmra.mxu0 %vm119_vm0, %v2476_v21  ;;  %2007 = vmatmul.msk.f32.gmra.mxu1 %vm119_vm0, %v2487_v22  ;;  %v2203_v6 = vunpack.i.h.bf16 %v2201_v14  ;;  %v2202_v3 = vunpack.i.l.bf16 %v2201_v14 }
 0x20e   :  { %v2216_v7 = vpop.permute.xlu0 %2215  ;;  %v2206_v16 = vpop.permute.xlu1 %2205 }
 0x20f   :  { %v3026_v12 = vpop.permute.xlu2 %2265  ;;  %2003 = vmatmul.msk.f32.gmra.mxu0 %vm119_vm0, %v2487_v22  ;;  %2008 = vmatmul.msk.f32.gmra.mxu1 %vm119_vm0, %v2498_v23  ;;  %v2218_v22 = vunpack.i.h.bf16 %v2216_v7  ;;  %v2217_v63 = vunpack.i.l.bf16 %v2216_v7  ;;  %v2208_v47 = vunpack.i.h.bf16 %v2206_v16  ;;  %v2207_v50 = vunpack.i.l.bf16 %v2206_v16 }
 0x210   :  { %v683_v16 = vsel %vm675_vm13, %v672_v60, %v2203_v6 }
 0x211   :  { %v760_v38 = vsel %vm756_vm12, %v2217_v63, %v2218_v22  ;;  %v759_v13 = vsel %vm756_vm12, %v2213_v39, %v2217_v63  ;;  %v758_v35 = vsel %vm756_vm12, %v2208_v47, %v2212_v44  ;;  %v757_v7 = vsel %vm756_vm12, %v2207_v50, %v2208_v47  ;;  %v3784_v63 = vld [vmem:[#allocation4_spill] sm:$0xff] }
 0x216   :  { %v2226_v19 = vpop.permute.xlu0 %2225  ;;  %v2221_v21 = vpop.permute.xlu1 %2220 }
 0x217   :  { %v2228_v33 = vunpack.i.h.bf16 %v2226_v19  ;;  %v2227_v24 = vunpack.i.l.bf16 %v2226_v19  ;;  %v3032_v0 = vpop.permute.xlu2 %2285  ;;  %2004 = vmatmul.msk.f32.gmra.mxu0 %vm119_vm0, %v2498_v23  ;;  %v2223_v20 = vunpack.i.h.bf16 %v2221_v21  ;;  %v2222_v46 = vunpack.i.l.bf16 %v2221_v21 }
 0x218   :  { %3774 = vst [vmem:[#allocation15_spill] sm:$0xff] %v3032_v0  ;;  %v2197_v19 = vunpack.i.l.bf16 %v2846_v57  ;;  %v680_v21 = vsel %vm675_vm13, %v2887_v11, %v3010_v10  ;;  %v679_v57 = vsel %vm675_vm13, %v3012_v15, %v2198_v52 }
 0x219   :  { %v764_v5 = vsel %vm756_vm12, %v2227_v24, %v2228_v33  ;;  %v761_v17 = vsel %vm756_vm12, %v2222_v46, %v2223_v20  ;;  %v681_v33 = vsel %vm675_vm13, %v3010_v10, %v2202_v3  ;;  %v676_v10 = vsel %vm675_vm13, %v2956_v34, %v3000_v58  ;;  %v3783_v34 = vld [vmem:[#allocation6_spill] sm:$0xff] }
 0x21a   :  { %1018 = vmatpush.msrb.mxu2 %v764_v5  ;;  %v677_v5 = vsel %vm675_vm13, %v3000_v58, %v2197_v19 }
 0x21e   :  { %v3037_v28 = vpop.permute.xlu1 %2230 }
 0x21f   :  { %v670_v26 = vpop.permute.xlu2 %669  ;;  %v2233_v58 = vunpack.i.h.bf16 %v3037_v28  ;;  %v3809_v8 = vld [vmem:[#allocation15_spill] sm:$0xff] }
 0x220   :  { %v682_v14 = vsel %vm675_vm13, %v670_v26, %v672_v60  ;;  %v3775_v60 = vmov 0.0  }
 0x221   :  { %2240 = vrot.lane.b32.xlu0 %v3775_v60, %s2366_s0  ;;  %v833_v22 = vsel %vm829_vm10, %v2835_v48, %v2233_v58 }
 0x226   :  { %v3045_v40 = vpop.permute.xlu1 %2250 }
 0x227   :  { %v2291_v61 = vpop.permute.xlu2 %2290 }
 0x228   :  { %v2293_v62 = vunpack.i.h.bf16 %v2291_v61  ;;  %v2292_v53 = vunpack.i.l.bf16 %v2291_v61 }
 0x229   :  { %2270 = vrot.lane.b32.xlu0 %v3775_v60, %s2372_s30 }
 0x22a   :  { %v763_v1 = vsel %vm756_vm12, %v2293_v62, %v2227_v24  ;;  %v762_v23 = vsel %vm756_vm12, %v2223_v20, %v2292_v53  ;;  %v2193_v24 = vunpack.i.h.bf16 %v2910_v31  ;;  %v678_v31 = vsel %vm675_vm13, %v2998_v49, %v3012_v15 }
 0x22b   :  { %958 = vmatpush.msra.mxu3 %v763_v1  ;;  %1019 = vmatpush.msrb.mxu2 %v762_v23  ;;  %v3787_v23 = vld [vmem:[#allocation7_spill] sm:$0xff] }
 0x22c   :  { %v602_v26 = vsel %vm594_vm3, %v2806_v32, %v2193_v24 }
 0x22d   :  { %959 = vmatpush.msra.mxu3 %v761_v17  ;;  %1020 = vmatpush.msrb.mxu2 %v760_v38 }
 0x22e   :  { %v589_v11 = vpop.permute.xlu1 %588 }
 0x22f   :  { %960 = vmatpush.msra.mxu3 %v759_v13  ;;  %1021 = vmatpush.msrb.mxu2 %v758_v35  ;;  %v601_v49 = vsel %vm594_vm3, %v589_v11, %v2806_v32  ;;  %v3776_v32 = vld [vmem:[#allocation14_spill] sm:$0xff]  ;;  %v3790_v13 = vld [vmem:[#allocation9_spill] sm:$0xff] }
 0x231   :  { %961 = vmatpush.msra.mxu3 %v757_v7  ;;  %2051 = vmatpush.msk.msrb.mxu2 %vm2799_vm7, %v683_v16 }
 0x232   :  { %2275 = vrot.lane.b32.xlu0 %v3775_v60, %s2372_s30 }
 0x233   :  { %2027 = vmatpush.msk.msra.mxu3 %vm2795_vm6, %v682_v14  ;;  %2052 = vmatpush.msk.msrb.mxu2 %vm2799_vm7, %v681_v33 }
 0x235   :  { %2028 = vmatpush.msk.msra.mxu3 %vm2795_vm6, %v680_v21  ;;  %2053 = vmatpush.msk.msrb.mxu2 %vm2799_vm7, %v679_v57 }
 0x237   :  { %2029 = vmatpush.msk.msra.mxu3 %vm2795_vm6, %v678_v31  ;;  %2054 = vmatpush.msk.msrb.mxu2 %vm2799_vm7, %v677_v5  ;;  %v3793_v31 = vld [vmem:[#allocation13_spill] sm:$0xff] }
 0x239   :  { %2030 = vmatpush.msk.msra.mxu3 %vm2795_vm6, %v676_v10  ;;  %2055 = vmatpush.msk.msrb.mxu2 %vm2831_vm9, %v602_v26 }
 0x23a   :  { %2280 = vrot.lane.b32.xlu0 %v3775_v60, %s2369_s29 }
 0x23b   :  { %2031 = vmatpush.msk.msra.mxu3 %vm2827_vm8, %v601_v49  ;;  %2056 = vmatpush.msk.msrb.mxu2 %vm2831_vm9, %v2938_v55  ;;  %v3781_v55 = vld [vmem:[#allocation10_spill] sm:$0xff] }
 0x23d   :  { %2032 = vmatpush.msk.msra.mxu3 %vm2827_vm8, %v2923_v54  ;;  %2057 = vmatpush.msk.msrb.mxu2 %vm2831_vm9, %v2892_v37  ;;  %v3777_v54 = vld [vmem:[#allocation11_spill] sm:$0xff]  ;;  %v3778_v37 = vld [vmem:[#allocation12_spill] sm:$0xff] }
 0x23f   :  { %2033 = vmatpush.msk.msra.mxu3 %vm2827_vm8, %v2896_v30  ;;  %2058 = vmatpush.msk.msrb.mxu2 %vm2831_vm9, %v2673_v29  ;;  %v3779_v30 = vld [vmem:[#allocation8_spill] sm:$0xff]  ;;  %v3126_v29 = vld [vmem:[%s3714_s4 + $0x8] sm:$0xff] }
 0x240   :  { %3780 = vst [vmem:[#allocation14_spill] sm:$0xff] %v3126_v29 }
 0x241   :  { %2034 = vmatpush.msk.msra.mxu3 %vm2827_vm8, %v2694_v41  ;;  %1030 = vmatpush.msrb.mxu2 %v2591_v56  ;;  %v2238_v41 = vunpack.i.h.bf16 %v2964_v2  ;;  %v3782_v56 = vld [vmem:[#allocation5_spill] sm:$0xff]  ;;  %v2232_v2 = vunpack.i.l.bf16 %v3037_v28 }
 0x243   :  { %970 = vmatpush.msra.mxu3 %v3776_v32  ;;  %1031 = vmatpush.msrb.mxu2 %v3777_v54  ;;  %v837_v15 = vsel %vm829_vm10, %v2759_v36, %v2238_v41  ;;  %v831_v36 = vsel %vm829_vm10, %v2785_v25, %v2232_v2 }
 0x245   :  { %971 = vmatpush.msra.mxu3 %v3778_v37  ;;  %1032 = vmatpush.msrb.mxu2 %v3779_v30 }
 0x247   :  { %972 = vmatpush.msra.mxu3 %v3781_v55  ;;  %1033 = vmatpush.msrb.mxu2 %v3782_v56 }
 0x248   :  { %1034 = vmatmul.f32.vlgmr.msrb.gmra.mxu2 %v3126_v29 }
 0x249   :  { %973 = vmatpush.msra.mxu3 %v3783_v34 }
 0x24a   :  { %974 = vmatmul.f32.vlgmr.msra.gmra.mxu3 %v3126_v29  ;;  %v2248_v29 = vunpack.i.h.bf16 %v3004_v59 }
 0x24b   :  { %2059 = vmatpush.msk.msrb.mxu3 %vm2831_vm9, %v837_v15 }
 0x24d   :  { %2060 = vmatpush.msk.msrb.mxu3 %vm2831_vm9, %v2983_v18 }
 0x24f   :  { %2061 = vmatpush.msk.msrb.mxu3 %vm2831_vm9, %v833_v22 }
 0x251   :  { %2062 = vmatpush.msk.msrb.mxu3 %vm2831_vm9, %v831_v36 }
 0x252   :  { %1998 = vmatmul.msk.f32.vlgmr.msrb.gmra.mxu3 %vm934_vm11, %v2993_v9 }
 0x26c   :  { %v3155_v28 = vpop.f32.mrf.mxu0  ;;  %v3157_v18 = vpop.f32.mrf.mxu1 }
 0x274   :  { %v1117_v48 = vpop.f32.mrf.mxu1  ;;  %v3160_v20 = vpop.f32.mrf.mxu0 }
 0x275   :  { %v1118_v61 = vadd.f32 %v1117_v48, %v3784_v63 }
 0x277   :  { %v3162_v46 = vmax.f32 %v1118_v61, 0.0 }
 0x279   :  { %3785 = vst [vmem:[#allocation11_spill] sm:$0xff] %v3162_v46  ;;  %1327 = vrot.lane.b32.xlu0 %v3162_v46, %s2367_s22  ;;  %1174 = vrot.lane.b32.xlu2 %v3162_v46, %s2366_s0  ;;  %v2299_v25 = vpack.i.bf16 0.0, %v3162_v46 }
 0x27b   :  { %2300 = vrot.lane.b32.xlu1 %v2299_v25, %s2373_s6 }
 0x27c   :  { %v1088_v62 = vpop.f32.mrf.mxu0  ;;  %v1120_v1 = vpop.f32.mrf.mxu1 }
 0x27d   :  { %v1089_v53 = vadd.f32 %v1088_v62, %v3784_v63  ;;  %v1121_v39 = vadd.f32 %v1120_v1, %v3787_v23 }
 0x27f   :  { %v3176_v47 = vmax.f32 %v1089_v53, 0.0  ;;  %v3185_v44 = vmax.f32 %v1121_v39, 0.0 }
 0x281   :  { %1501 = vrot.lane.b32.xlu0 %v3162_v46, %s2369_s29  ;;  %2295 = vrot.lane.b32.xlu2 %v2299_v25, %s2370_s2  ;;  %3786 = vst [vmem:[#allocation12_spill] sm:$0xff] %v3176_v47  ;;  %v2304_v38 = vpack.i.bf16 %v3176_v47, %v3775_v60  ;;  %v2309_v19 = vpack.i.bf16 0.0, %v3185_v44 }
 0x282   :  { %3788 = vst [vmem:[#allocation8_spill] sm:$0xff] %v3185_v44 }
 0x283   :  { %1407 = vrot.lane.b32.xlu1 %v3162_v46, %s2368_s26 }
 0x284   :  { %v1091_v6 = vpop.f32.mrf.mxu0  ;;  %v1123_v3 = vpop.f32.mrf.mxu1 }
 0x285   :  { %v1092_v50 = vadd.f32 %v1091_v6, %v3787_v23  ;;  %v1124_v35 = vadd.f32 %v1123_v3, %v3790_v13  ;;  %v2252_v3 = vunpack.i.l.bf16 %v3045_v40 }
 0x287   :  { %v3194_v17 = vmax.f32 %v1092_v50, 0.0  ;;  %v3209_v7 = vmax.f32 %v1124_v35, 0.0 }
 0x289   :  { %1581 = vrot.lane.b32.xlu2 %v3162_v46, %s2372_s30  ;;  %1325 = vrot.lane.b32.xlu0 %v3176_v47, %s2367_s22  ;;  %3789 = vst [vmem:[#allocation10_spill] sm:$0xff] %v3194_v17  ;;  %v2314_v52 = vpack.i.bf16 %v3185_v44, %v3194_v17  ;;  %v2319_v16 = vpack.i.bf16 0.0, %v3209_v7  ;;  %v2329_v14 = vpack.i.bf16 %v3176_v47, %v3194_v17 }
 0x28a   :  { %3791 = vst [vmem:[#allocation5_spill] sm:$0xff] %v3209_v7 }
 0x28b   :  { %1172 = vrot.lane.b32.xlu1 %v3176_v47, %s2366_s0 }
 0x28c   :  { %v1094_v33 = vpop.f32.mrf.mxu0  ;;  %v1126_v57 = vpop.f32.mrf.mxu1 }
 0x28d   :  { %v1095_v24 = vadd.f32 %v1094_v33, %v3790_v13  ;;  %v1127_v5 = vadd.f32 %v1126_v57, %v3793_v31 }
 0x28f   :  { %v3233_v21 = vmax.f32 %v1095_v24, 0.0  ;;  %v3244_v10 = vmax.f32 %v1127_v5, 0.0 }
 0x291   :  { %1587 = vrot.lane.b32.xlu2 %v3185_v44, %s2372_s30  ;;  %1579 = vrot.lane.b32.xlu0 %v3176_v47, %s2372_s30  ;;  %3792 = vst [vmem:[#allocation6_spill] sm:$0xff] %v3233_v21  ;;  %v2339_v54 = vpack.i.bf16 0.0, %v3244_v10  ;;  %v2334_v39 = vpack.i.bf16 %v3233_v21, %v3775_v60  ;;  %v3815_v27 = vld [vmem:[#allocation5_spill] sm:$0xff] }
 0x292   :  { %3794 = vst [vmem:[#allocation4_spill] sm:$0xff] %v3244_v10 }
 0x293   :  { %1180 = vrot.lane.b32.xlu1 %v3185_v44, %s2366_s0  ;;  %v3242_v11 = vpop.permute.xlu0 %2240 }
 0x294   :  { %v1097_v2 = vpop.f32.mrf.mxu0 }
 0x295   :  { %v1098_v22 = vadd.f32 %v1097_v2, %v3793_v31 }
 0x299   :  { %1739 = vrot.lane.b32.xlu2 %v3185_v44, %s2371_s1  ;;  %1178 = vrot.lane.b32.xlu0 %v3194_v17, %s2366_s0 }
 0x29b   :  { %2305 = vrot.lane.b32.xlu1 %v2304_v38, %s2370_s2  ;;  %v3252_v49 = vpop.permute.xlu0 %2270 }
 0x2a1   :  { %1731 = vrot.lane.b32.xlu2 %v3176_v47, %s2371_s1  ;;  %2315 = vrot.lane.b32.xlu0 %v2314_v52, %s2370_s2  ;;  %v2242_v52 = vunpack.i.l.bf16 %v3242_v11 }
 0x2a3   :  { %1405 = vrot.lane.b32.xlu1 %v3176_v47, %s2368_s26 }
 0x2a4   :  { %v2276_v58 = vpop.permute.xlu0 %2275 }
 0x2a5   :  { %v2278_v36 = vunpack.i.h.bf16 %v2276_v58 }
 0x2a9   :  { %2320 = vrot.lane.b32.xlu2 %v2319_v16, %s2370_s2  ;;  %1411 = vrot.lane.b32.xlu0 %v3194_v17, %s2368_s26 }
 0x2ab   :  { %2310 = vrot.lane.b32.xlu1 %v2309_v19, %s2373_s6 }
 0x2b1   :  { %1331 = vrot.lane.b32.xlu2 %v3194_v17, %s2367_s22  ;;  %2330 = vrot.lane.b32.xlu0 %v2329_v14, %s2373_s6 }
 0x2b3   :  { %1413 = vrot.lane.b32.xlu1 %v3185_v44, %s2368_s26 }
 0x2b9   :  { %1593 = vrot.lane.b32.xlu2 %v3209_v7, %s2372_s30  ;;  %1585 = vrot.lane.b32.xlu0 %v3194_v17, %s2372_s30 }
 0x2bb   :  { %1333 = vrot.lane.b32.xlu1 %v3185_v44, %s2367_s22 }
 0x2c1   :  { %1513 = vrot.lane.b32.xlu2 %v3209_v7, %s2369_s29  ;;  %1184 = vrot.lane.b32.xlu0 %v3233_v21, %s2366_s0 }
 0x2c3   :  { %1507 = vrot.lane.b32.xlu1 %v3185_v44, %s2369_s29 }
 0x2c9   :  { %1745 = vrot.lane.b32.xlu2 %v3209_v7, %s2371_s1  ;;  %1192 = vrot.lane.b32.xlu0 %v3244_v10, %s2366_s0 }
 0x2cb   :  { %1186 = vrot.lane.b32.xlu1 %v3209_v7, %s2366_s0  ;;  %v1035_v30 = vpop.f32.mrf.mxu2 }
 0x2cc   :  { %v1036_v55 = vadd.f32 %v1035_v30, %v3157_v18  ;;  %v3283_v18 = vmax.f32 %v1098_v22, 0.0 }
 0x2cd   :  { %v975_v26 = vpop.f32.mrf.mxu3 }
 0x2ce   :  { %v976_v32 = vadd.f32 %v975_v26, %v3155_v28  ;;  %v3281_v28 = vpop.permute.xlu0 %2280  ;;  %3795 = vst [vmem:[#allocation7_spill] sm:$0xff] %v3283_v18  ;;  %v2344_v61 = vpack.i.bf16 %v3244_v10, %v3283_v18  ;;  %v2349_v23 = vpack.i.bf16 %v3233_v21, %v3283_v18 }
 0x2d0   :  { %v996_v37 = vadd.f32 %v3160_v20, %v976_v32  ;;  %v2277_v20 = vunpack.i.l.bf16 %v2276_v58  ;;  %v2268_v32 = vunpack.i.h.bf16 %v3026_v12 }
 0x2d1   :  { %2340 = vrot.lane.b32.xlu2 %v2339_v54, %s2373_s6  ;;  %1337 = vrot.lane.b32.xlu0 %v3233_v21, %s2367_s22  ;;  %v2243_v54 = vunpack.i.h.bf16 %v3242_v11 }
 0x2d2   :  { %1060 = vst [vmem:[%s3711_s5 + $0x10] sm:$0xff] %v996_v37 }
 0x2d3   :  { %v1175_v41 = vpop.permute.xlu2 %1174  ;;  %2325 = vrot.lane.b32.xlu1 %v2319_v16, %s2373_s6 }
 0x2d5   :  { %v1055_v56 = vpop.f32.mrf.mxu3 }
 0x2d6   :  { %v1056_v34 = vadd.f32 %v1055_v56, %v1036_v55 }
 0x2d8   :  { %1061 = vst [vmem:[%s3711_s5 + $0x18] sm:$0xff] %v1056_v34 }
 0x2d9   :  { %1599 = vrot.lane.b32.xlu2 %v3244_v10, %s2372_s30  ;;  %1425 = vrot.lane.b32.xlu0 %v3244_v10, %s2368_s26 }
 0x2db   :  { %v3272_v15 = vpop.permute.xlu2 %2295  ;;  %1419 = vrot.lane.b32.xlu1 %v3209_v7, %s2368_s26 }
 0x2dc   :  { %v2297_v58 = vunpack.i.l.bf16 %v3272_v15 }
 0x2e1   :  { %1519 = vrot.lane.b32.xlu2 %v3244_v10, %s2369_s29  ;;  %1751 = vrot.lane.b32.xlu0 %v3244_v10, %s2371_s1 }
 0x2e3   :  { %v1582_v48 = vpop.permute.xlu2 %1581  ;;  %1339 = vrot.lane.b32.xlu1 %v3209_v7, %s2367_s22 }
 0x2e4   :  { %v3288_v63 = vsel %vm675_vm13, %v1582_v48, %v2278_v36 }
 0x2e5   :  { %3796 = vst [vmem:[#allocation9_spill] sm:$0xff] %v3288_v63 }
 0x2e9   :  { %1190 = vrot.lane.b32.xlu2 %v3283_v18, %s2366_s0  ;;  %2345 = vrot.lane.b32.xlu0 %v2344_v61, %s2370_s2  ;;  %v2298_v61 = vunpack.i.h.bf16 %v3272_v15 }
 0x2eb   :  { %v1328_v25 = vpop.permute.xlu0 %1327  ;;  %v3295_v62 = vpop.permute.xlu2 %1587  ;;  %1737 = vrot.lane.b32.xlu1 %v3194_v17, %s2371_s1 }
 0x2ec   :  { %v3301_v53 = vsel %vm675_vm13, %v3295_v62, %v2277_v20 }
 0x2ed   :  { %v3303_v1 = vpop.permute.xlu1 %2300 }
 0x2f1   :  { %2350 = vrot.lane.b32.xlu2 %v2349_v23, %s2373_s6  ;;  %1423 = vrot.lane.b32.xlu0 %v3283_v18, %s2368_s26 }
 0x2f3   :  { %v3312_v6 = vpop.permute.xlu0 %1501  ;;  %v3314_v50 = vpop.permute.xlu2 %1739  ;;  %2335 = vrot.lane.b32.xlu1 %v2334_v39, %s2370_s2 }
 0x2f4   :  { %3797 = vst [vmem:[#allocation13_spill] sm:$0xff] %v3312_v6  ;;  %v3751_v6 = vunpack.i.l.bf16 %v3303_v1 }
 0x2f5   :  { %v1408_v38 = vpop.permute.xlu1 %1407 }
 0x2f9   :  { %1749 = vrot.lane.b32.xlu2 %v3283_v18, %s2371_s1  ;;  %1343 = vrot.lane.b32.xlu0 %v3283_v18, %s2367_s22 }
 0x2fb   :  { %v3322_v13 = vpop.permute.xlu2 %1731  ;;  %v1326_v35 = vpop.permute.xlu0 %1325  ;;  %1417 = vrot.lane.b32.xlu1 %v3233_v21, %s2368_s26 }
 0x2fc   :  { %v3328_v16 = vsel %vm416_vm1, %v2252_v3, %v1326_v35  ;;  %v3331_v19 = vsel %vm416_vm1, %v1326_v35, %v1328_v25  ;;  %v2262_v3 = vunpack.i.l.bf16 %v3020_v45 }
 0x2fd   :  { %v1173_v14 = vpop.permute.xlu1 %1172 }
 0x2fe   :  { %v3334_v33 = vsel %vm258_vm4, %v2242_v52, %v1173_v14  ;;  %v3337_v24 = vsel %vm258_vm4, %v1173_v14, %v1175_v41 }
 0x301   :  { %1505 = vrot.lane.b32.xlu2 %v3194_v17, %s2369_s29  ;;  %1597 = vrot.lane.b32.xlu0 %v3283_v18, %s2372_s30 }
 0x303   :  { %v3343_v57 = vpop.permute.xlu2 %2320  ;;  %v1580_v31 = vpop.permute.xlu0 %1579  ;;  %1345 = vrot.lane.b32.xlu1 %v3244_v10, %s2367_s22 }
 0x304   :  { %v3348_v5 = vsel %vm675_vm13, %v1580_v31, %v1582_v48  ;;  %v2263_v48 = vunpack.i.h.bf16 %v3020_v45 }
 0x305   :  { %v1181_v26 = vpop.permute.xlu1 %1180 }
 0x309   :  { %2360 = vrot.lane.b32.xlu2 %v3775_v60, %s2371_s1  ;;  %1733 = vrot.lane.b32.xlu0 %v3162_v46, %s2371_s1 }
 0x30b   :  { %v1332_v37 = vpop.permute.xlu2 %1331  ;;  %v1179_v30 = vpop.permute.xlu0 %1178  ;;  %1591 = vrot.lane.b32.xlu1 %v3233_v21, %s2372_s30 }
 0x30c   :  { %v3359_v41 = vsel %vm416_vm1, %v2268_v32, %v1332_v37  ;;  %v3362_v55 = vsel %vm258_vm4, %v2243_v54, %v1179_v30  ;;  %v3365_v56 = vsel %vm258_vm4, %v1179_v30, %v1181_v26 }
 0x30d   :  { %v3367_v34 = vpop.permute.xlu1 %2305 }
 0x30e   :  { %v3735_v11 = vunpack.i.h.bf16 %v3367_v34 }
 0x310   :  { %v3374_v2 = vsel %vm339_vm5, %v3735_v11, %v2297_v58 }
 0x311   :  { %2355 = vrot.lane.b32.xlu0 %v3775_v60, %s2371_s1 }
 0x313   :  { %v3378_v22 = vpop.permute.xlu2 %1593  ;;  %v3380_v36 = vpop.permute.xlu0 %2315  ;;  %1743 = vrot.lane.b32.xlu1 %v3233_v21, %s2371_s1 }
 0x314   :  { %v3734_v20 = vunpack.i.l.bf16 %v3380_v36 }
 0x315   :  { %v1406_v25 = vpop.permute.xlu1 %1405 }
 0x316   :  { %v3388_v23 = vsel %vm497_vm2, %v2263_v48, %v1406_v25  ;;  %v3391_v39 = vsel %vm497_vm2, %v1406_v25, %v1408_v38  ;;  %v3396_v60 = vsel %vm339_vm5, %v2298_v61, %v3734_v20  ;;  %v2247_v61 = vunpack.i.l.bf16 %v3004_v59 }
 0x317   :  { %v2272_v25 = vunpack.i.l.bf16 %v3252_v49 }
 0x31b   :  { %v3399_v35 = vpop.permute.xlu2 %1513  ;;  %v1412_v52 = vpop.permute.xlu0 %1411  ;;  %1511 = vrot.lane.b32.xlu1 %v3233_v21, %s2369_s29 }
 0x31c   :  { %v3404_v15 = vsel %vm497_vm2, %v2262_v3, %v1412_v52 }
 0x31d   :  { %v3406_v14 = vpop.permute.xlu1 %2310 }
 0x323   :  { %v3408_v38 = vpop.permute.xlu2 %1745  ;;  %v2331_v31 = vpop.permute.xlu0 %2330  ;;  %1517 = vrot.lane.b32.xlu1 %v3283_v18, %s2369_s29 }
 0x325   :  { %v1414_v26 = vpop.permute.xlu1 %1413 }
 0x326   :  { %v3413_v45 = vsel %vm497_vm2, %v1412_v52, %v1414_v26  ;;  %v2287_v26 = vunpack.i.l.bf16 %v3032_v0 }
 0x32b   :  { %v3415_v32 = vpop.permute.xlu2 %2340  ;;  %v1586_v54 = vpop.permute.xlu0 %1585  ;;  %1499 = vrot.lane.b32.xlu1 %v3176_v47, %s2369_s29 }
 0x32c   :  { %v3421_v30 = vsel %vm675_vm13, %v1586_v54, %v3295_v62  ;;  %v3752_v21 = vunpack.i.l.bf16 %v3415_v32 }
 0x32d   :  { %v1334_v58 = vpop.permute.xlu1 %1333 }
 0x32e   :  { %v3424_v48 = vsel %vm416_vm1, %v1332_v37, %v1334_v58 }
 0x333   :  { %v3428_v3 = vpop.permute.xlu2 %1599  ;;  %v1185_v52 = vpop.permute.xlu0 %1184 }
 0x334   :  { %v3433_v20 = vsel %vm675_vm13, %v3428_v3, %v2272_v25  ;;  %v3436_v62 = vsel %vm258_vm4, %v2247_v61, %v1185_v52 }
 0x335   :  { %v3438_v54 = vpop.permute.xlu1 %1507 }
 0x336   :  { %3798 = vst [vmem:[#allocation16_spill] sm:$0xff] %v3438_v54  ;;  %v3442_v37 = vsel %vm594_vm3, %v3438_v54, %v2287_v26 }
 0x337   :  { %3799 = vst [vmem:[#allocation17_spill] sm:$0xff] %v3442_v37 }
 0x33b   :  { %v3444_v58 = vpop.permute.xlu2 %1519  ;;  %v1193_v11 = vpop.permute.xlu0 %1192 }
 0x33d   :  { %v1187_v46 = vpop.permute.xlu1 %1186 }
 0x33e   :  { %v3447_v44 = vsel %vm258_vm4, %v1185_v52, %v1187_v46  ;;  %v2332_v52 = vunpack.i.l.bf16 %v2331_v31 }
 0x343   :  { %v1191_v25 = vpop.permute.xlu2 %1190  ;;  %v1338_v47 = vpop.permute.xlu0 %1337 }
 0x344   :  { %v3451_v61 = vsel %vm258_vm4, %v2248_v29, %v1191_v25  ;;  %v3454_v7 = vsel %vm258_vm4, %v1191_v25, %v1193_v11  ;;  %v3749_v11 = vunpack.i.l.bf16 %v3406_v14  ;;  %v2333_v25 = vunpack.i.h.bf16 %v2331_v31 }
 0x345   :  { %v3456_v17 = vpop.permute.xlu1 %2325 }
 0x346   :  { %v3750_v59 = vunpack.i.l.bf16 %v3456_v17  ;;  %v1683_v31 = vsel %vm756_vm12, %v2333_v25, %v3751_v6 }
 0x34b   :  { %v2351_v26 = vpop.permute.xlu2 %2350  ;;  %v1426_v10 = vpop.permute.xlu0 %1425 }
 0x34c   :  { %v2353_v18 = vunpack.i.h.bf16 %v2351_v26  ;;  %v2352_v37 = vunpack.i.l.bf16 %v2351_v26  ;;  %v1685_v26 = vsel %vm756_vm12, %v2332_v52, %v3749_v11  ;;  %v2257_v52 = vunpack.i.l.bf16 %v3014_v51 }
 0x34d   :  { %v1420_v46 = vpop.permute.xlu1 %1419 }
 0x34e   :  { %v1689_v29 = vsel %vm756_vm12, %v2352_v37, %v3752_v21  ;;  %v1687_v0 = vsel %vm756_vm12, %v2353_v18, %v3750_v59 }
 0x34f   :  { %1879 = vmatpush.msrb.mxu0 %v1689_v29 }
 0x351   :  { %1880 = vmatpush.msrb.mxu0 %v1687_v0 }
 0x353   :  { %v1750_v63 = vpop.permute.xlu2 %1749  ;;  %v3471_v54 = vpop.permute.xlu0 %1751  ;;  %1881 = vmatpush.msrb.mxu0 %v1685_v26 }
 0x354   :  { %v1761_v37 = vsel %vm829_vm10, %v1750_v63, %v3471_v54 }
 0x355   :  { %2083 = vmatpush.msk.msra.mxu2 %vm2827_vm8, %v1761_v37  ;;  %v1340_v0 = vpop.permute.xlu1 %1339  ;;  %1882 = vmatpush.msrb.mxu0 %v1683_v31  ;;  %v2258_v37 = vunpack.i.h.bf16 %v3014_v51  ;;  %v2253_v51 = vunpack.i.h.bf16 %v3045_v40 }
 0x35b   :  { %v2346_v18 = vpop.permute.xlu0 %2345 }
 0x35d   :  { %v3480_v29 = vpop.permute.xlu1 %1737 }
 0x363   :  { %v1424_v11 = vpop.permute.xlu0 %1423 }
 0x364   :  { %v1433_v26 = vsel %vm497_vm2, %v2257_v52, %v1424_v11  ;;  %v1434_v59 = vsel %vm497_vm2, %v1424_v11, %v1426_v10  ;;  %v2348_v11 = vunpack.i.h.bf16 %v2346_v18 }
 0x365   :  { %2063 = vmatpush.msk.msra.mxu3 %vm2795_vm6, %v1433_v26  ;;  %2087 = vmatpush.msk.msrb.mxu1 %vm2799_vm7, %v1434_v59  ;;  %v2336_v63 = vpop.permute.xlu1 %2335 }
 0x366   :  { %v2337_v59 = vunpack.i.l.bf16 %v2336_v63 }
 0x36b   :  { %v1344_v25 = vpop.permute.xlu0 %1343 }
 0x36d   :  { %v1418_v31 = vpop.permute.xlu1 %1417 }
 0x36e   :  { %v1431_v6 = vsel %vm497_vm2, %v2258_v37, %v1418_v31  ;;  %v1432_v21 = vsel %vm497_vm2, %v1418_v31, %v1420_v46  ;;  %v2338_v46 = vunpack.i.h.bf16 %v2336_v63  ;;  %v2318_v63 = vunpack.i.h.bf16 %v3380_v36 }
 0x36f   :  { %2064 = vmatpush.msk.msra.mxu3 %vm2795_vm6, %v1431_v6  ;;  %2088 = vmatpush.msk.msrb.mxu1 %vm2799_vm7, %v1432_v21  ;;  %v2267_v21 = vunpack.i.l.bf16 %v3026_v12  ;;  %v1353_v6 = vsel %vm416_vm1, %v2253_v51, %v1344_v25  ;;  %v1352_v12 = vsel %vm416_vm1, %v1338_v47, %v1340_v0  ;;  %v2307_v0 = vunpack.i.l.bf16 %v3367_v34 }
 0x370   :  { %v1279_v26 = vsel %vm339_vm5, %v2337_v59, %v2338_v46  ;;  %v3801_v31 = vunpack.i.l.bf16 %v3380_v36 }
 0x371   :  { %2065 = vmatpush.msk.msra.mxu3 %vm2795_vm6, %v3404_v15  ;;  %2089 = vmatpush.msk.msrb.mxu1 %vm2799_vm7, %v3413_v45 }
 0x373   :  { %v1598_v10 = vpop.permute.xlu0 %1597  ;;  %2066 = vmatpush.msk.msra.mxu3 %vm2795_vm6, %v3388_v23  ;;  %2090 = vmatpush.msk.msrb.mxu1 %vm2799_vm7, %v3391_v39  ;;  %v1351_v23 = vsel %vm416_vm1, %v2267_v21, %v1338_v47  ;;  %v2347_v39 = vunpack.i.l.bf16 %v2346_v18 }
 0x374   :  { %v1609_v15 = vsel %vm675_vm13, %v1598_v10, %v3428_v3  ;;  %v2323_v3 = vunpack.i.h.bf16 %v3343_v57 }
 0x375   :  { %2067 = vmatpush.msk.msra.mxu3 %vm2827_vm8, %v1353_v6  ;;  %v1346_v40 = vpop.permute.xlu1 %1345  ;;  %2075 = vmatpush.msk.msrb.mxu0 %vm2795_vm6, %v1609_v15 }
 0x376   :  { %v1354_v45 = vsel %vm416_vm1, %v1344_v25, %v1346_v40  ;;  %v1281_v47 = vsel %vm339_vm5, %v2323_v3, %v2347_v39 }
 0x377   :  { %2068 = vmatpush.msk.msra.mxu3 %vm2827_vm8, %v1351_v23  ;;  %2091 = vmatpush.msk.msrb.mxu1 %vm2831_vm9, %v1354_v45  ;;  %v2273_v23 = vunpack.i.h.bf16 %v3252_v49 }
 0x379   :  { %2069 = vmatpush.msk.msra.mxu3 %vm2827_vm8, %v3359_v41  ;;  %2092 = vmatpush.msk.msrb.mxu1 %vm2831_vm9, %v1352_v12  ;;  %v3807_v12 = vld [vmem:[#allocation9_spill] sm:$0xff] }
 0x37b   :  { %v3530_v52 = vpop.permute.xlu0 %1733  ;;  %2070 = vmatpush.msk.msra.mxu3 %vm2827_vm8, %v3328_v16  ;;  %2093 = vmatpush.msk.msrb.mxu1 %vm2831_vm9, %v3424_v48  ;;  %v2322_v16 = vunpack.i.l.bf16 %v3343_v57  ;;  %v3548_v48 = vpop.permute.xlu2 %1505  ;;  %v3800_v57 = vunpack.i.h.bf16 %v3367_v34 }
 0x37d   :  { %1867 = vmatpush.msra.mxu3 %v1281_v47  ;;  %2094 = vmatpush.msk.msrb.mxu1 %vm2831_vm9, %v3331_v19  ;;  %v1592_v41 = vpop.permute.xlu1 %1591  ;;  %v1282_v19 = vsel %vm339_vm5, %v2347_v39, %v2348_v11  ;;  %v1280_v25 = vsel %vm339_vm5, %v2338_v46, %v2322_v16  ;;  %v1275_v37 = vsel %vm339_vm5, %v2307_v0, %v3800_v57  ;;  %v2283_v39 = vunpack.i.h.bf16 %v3281_v28  ;;  %v3808_v46 = vld [vmem:[#allocation13_spill] sm:$0xff]  ;;  %v3813_v47 = vld [vmem:[#allocation4_spill] sm:$0xff]  ;;  %v3819_v16 = vld [vmem:[#allocation11_spill] sm:$0xff] }
 0x37e   :  { %v1607_v18 = vsel %vm675_vm13, %v1592_v41, %v3378_v22  ;;  %v3814_v41 = vld [vmem:[#allocation10_spill] sm:$0xff]  ;;  %v3816_v0 = vld [vmem:[#allocation12_spill] sm:$0xff] }
 0x37f   :  { %1868 = vmatpush.msra.mxu3 %v1279_v26  ;;  %2076 = vmatpush.msk.msrb.mxu0 %vm2795_vm6, %v1607_v18  ;;  %v3817_v18 = vld [vmem:[#allocation14_spill] sm:$0xff]  ;;  %v3818_v26 = vld [vmem:[#allocation8_spill] sm:$0xff] }
 0x380   :  { %1927 = vmatpush.msrb.mxu1 %v1282_v19 }
 0x381   :  { %1869 = vmatpush.msra.mxu3 %v3396_v60  ;;  %2077 = vmatpush.msk.msrb.mxu0 %vm2795_vm6, %v3421_v30  ;;  %v1278_v60 = vsel %vm339_vm5, %v3801_v31, %v2318_v63  ;;  %v2343_v30 = vunpack.i.h.bf16 %v3415_v32 }
 0x382   :  { %1928 = vmatpush.msrb.mxu1 %v1280_v25 }
 0x383   :  { %1870 = vmatpush.msra.mxu3 %v1275_v37  ;;  %2078 = vmatpush.msk.msrb.mxu0 %vm2795_vm6, %v3348_v5  ;;  %v2356_v51 = vpop.permute.xlu0 %2355  ;;  %v1757_v5 = vsel %vm829_vm10, %v3480_v29, %v3314_v50 }
 0x384   :  { %1929 = vmatpush.msrb.mxu1 %v1278_v60  ;;  %v2357_v36 = vunpack.i.l.bf16 %v2356_v51  ;;  %v2358_v29 = vunpack.i.h.bf16 %v2356_v51 }
 0x385   :  { %v1744_v10 = vpop.permute.xlu1 %1743  ;;  %2071 = vmatpush.msk.msra.mxu3 %vm2795_vm6, %v3451_v61  ;;  %v2361_v61 = vpop.permute.xlu2 %2360 }
 0x386   :  { %v1759_v34 = vsel %vm829_vm10, %v1744_v10, %v3408_v38  ;;  %1930 = vmatpush.msrb.mxu1 %v3374_v2  ;;  %v2328_v2 = vunpack.i.h.bf16 %v3456_v17  ;;  %v2362_v6 = vunpack.i.l.bf16 %v2361_v61  ;;  %v2363_v15 = vunpack.i.h.bf16 %v2361_v61 }
 0x387   :  { %2072 = vmatpush.msk.msra.mxu3 %vm2795_vm6, %v3436_v62  ;;  %2084 = vmatpush.msk.msra.mxu2 %vm2827_vm8, %v1759_v34  ;;  %v1755_v62 = vsel %vm829_vm10, %v3322_v13, %v3530_v52  ;;  %v1762_v13 = vsel %vm829_vm10, %v3471_v54, %v2357_v36  ;;  %v3804_v54 = vunpack.i.l.bf16 %v3406_v14 }
 0x388   :  { %2095 = vmatpush.msk.msrb.mxu1 %vm2799_vm7, %v3454_v7  ;;  %v2313_v7 = vunpack.i.h.bf16 %v3406_v14  ;;  %v1758_v40 = vsel %vm829_vm10, %v3314_v50, %v2362_v6  ;;  %v1756_v14 = vsel %vm829_vm10, %v3530_v52, %v2363_v15  ;;  %v3812_v52 = vld [vmem:[#allocation6_spill] sm:$0xff] }
 0x389   :  { %2073 = vmatpush.msk.msra.mxu3 %vm2795_vm6, %v3362_v55  ;;  %2085 = vmatpush.msk.msra.mxu2 %vm2827_vm8, %v1757_v5  ;;  %v3802_v55 = vunpack.i.l.bf16 %v3415_v32 }
 0x38a   :  { %2096 = vmatpush.msk.msrb.mxu1 %vm2799_vm7, %v3447_v44  ;;  %v2303_v44 = vunpack.i.h.bf16 %v3303_v1 }
 0x38b   :  { %2074 = vmatpush.msk.msra.mxu3 %vm2795_vm6, %v3334_v33  ;;  %2086 = vmatpush.msk.msra.mxu2 %vm2827_vm8, %v1755_v62  ;;  %v1690_v21 = vsel %vm756_vm12, %v3802_v55, %v2343_v30  ;;  %v3803_v33 = vunpack.i.l.bf16 %v3456_v17  ;;  %v1686_v17 = vsel %vm756_vm12, %v3804_v54, %v2313_v7 }
 0x38c   :  { %2097 = vmatpush.msk.msrb.mxu1 %vm2799_vm7, %v3365_v56  ;;  %2009 = vmatmul.msk.f32.vlgmr.msra.gmra.mxu2 %vm934_vm11, %v2993_v9  ;;  %v1760_v56 = vsel %vm829_vm10, %v3408_v38, %v2358_v29 }
 0x38d   :  { %1939 = vmatpush.msrb.mxu2 %v1690_v21  ;;  %2107 = vmatpush.msk.msrb.mxu3 %vm2831_vm9, %v1762_v13  ;;  %v1512_v42 = vpop.permute.xlu1 %1511  ;;  %v1688_v32 = vsel %vm756_vm12, %v3803_v33, %v2328_v2 }
 0x38e   :  { %2098 = vmatpush.msk.msrb.mxu1 %vm2799_vm7, %v3337_v24  ;;  %1875 = vmatmul.f32.vlgmr.msra.gmra.mxu3 %v2954_v4  ;;  %v3805_v24 = vunpack.i.l.bf16 %v3303_v1  ;;  %v1527_v49 = vsel %vm594_vm3, %v1512_v42, %v3399_v35 }
 0x38f   :  { %1940 = vmatpush.msrb.mxu2 %v1688_v32  ;;  %2108 = vmatpush.msk.msrb.mxu3 %vm2831_vm9, %v1760_v56 }
 0x390   :  { %1935 = vmatmul.f32.vlgmr.msrb.gmra.mxu1 %v2954_v4  ;;  %v1684_v38 = vsel %vm756_vm12, %v3805_v24, %v2303_v44  ;;  %v1608_v4 = vsel %vm675_vm13, %v3378_v22, %v2273_v23  ;;  %v2282_v22 = vunpack.i.l.bf16 %v3281_v28  ;;  %v2288_v28 = vunpack.i.h.bf16 %v3809_v8 }
 0x391   :  { %1941 = vmatpush.msrb.mxu2 %v1686_v17  ;;  %2109 = vmatpush.msk.msrb.mxu3 %vm2831_vm9, %v1758_v40 }
 0x392   :  { %v1524_v11 = vsel %vm594_vm3, %v3808_v46, %v2288_v28 }
 0x393   :  { %1942 = vmatpush.msrb.mxu2 %v1684_v38  ;;  %2110 = vmatpush.msk.msrb.mxu3 %vm2831_vm9, %v1756_v14 }
 0x395   :  { %2099 = vmatpush.msk.msrb.mxu2 %vm2799_vm7, %v3433_v20  ;;  %v1518_v50 = vpop.permute.xlu1 %1517  ;;  %v3806_v20 = vld [vmem:[#allocation16_spill] sm:$0xff] }
 0x396   :  { %v1529_v1 = vsel %vm594_vm3, %v1518_v50, %v3444_v58  ;;  %2010 = vmatmul.msk.f32.vlgmr.msrb.gmra.mxu3 %vm934_vm11, %v2993_v9  ;;  %v1525_v45 = vsel %vm594_vm3, %v3548_v48, %v3806_v20  ;;  %v1528_v9 = vsel %vm594_vm3, %v3399_v35, %v2283_v39  ;;  %v3811_v35 = vld [vmem:[#allocation7_spill] sm:$0xff] }
 0x397   :  { %2100 = vmatpush.msk.msrb.mxu2 %vm2799_vm7, %v1608_v4  ;;  %2079 = vmatpush.msk.msrb.mxu0 %vm2827_vm8, %v1529_v1 }
 0x399   :  { %2101 = vmatpush.msk.msrb.mxu2 %vm2799_vm7, %v3301_v53  ;;  %2080 = vmatpush.msk.msrb.mxu0 %vm2827_vm8, %v1527_v49  ;;  %v1530_v53 = vsel %vm594_vm3, %v3444_v58, %v2282_v22  ;;  %v3810_v58 = vld [vmem:[#allocation17_spill] sm:$0xff] }
 0x39b   :  { %2102 = vmatpush.msk.msrb.mxu2 %vm2799_vm7, %v3807_v12  ;;  %2081 = vmatpush.msk.msrb.mxu0 %vm2827_vm8, %v1525_v45 }
 0x39d   :  { %2103 = vmatpush.msk.msrb.mxu2 %vm2831_vm9, %v1530_v53  ;;  %v1500_v3 = vpop.permute.xlu1 %1499 }
 0x39e   :  { %v1523_v59 = vsel %vm594_vm3, %v1500_v3, %v3808_v46 }
 0x39f   :  { %2104 = vmatpush.msk.msrb.mxu2 %vm2831_vm9, %v1528_v9  ;;  %2082 = vmatpush.msk.msrb.mxu0 %vm2827_vm8, %v1523_v59 }
 0x3a1   :  { %2105 = vmatpush.msk.msrb.mxu2 %vm2831_vm9, %v3810_v58  ;;  %1891 = vmatpush.msrb.mxu0 %v3811_v35 }
 0x3a3   :  { %2106 = vmatpush.msk.msrb.mxu2 %vm2831_vm9, %v1524_v11  ;;  %1892 = vmatpush.msrb.mxu0 %v3812_v52 }
 0x3a5   :  { %1951 = vmatpush.msrb.mxu2 %v3813_v47  ;;  %1893 = vmatpush.msrb.mxu0 %v3814_v41 }
 0x3a7   :  { %1952 = vmatpush.msrb.mxu2 %v3815_v27  ;;  %1894 = vmatpush.msrb.mxu0 %v3816_v0 }
 0x3a8   :  { %1895 = vmatmul.f32.vlgmr.msrb.gmra.mxu0 %v3817_v18 }
 0x3a9   :  { %1953 = vmatpush.msrb.mxu2 %v3818_v26 }
 0x3ab   :  { %1954 = vmatpush.msrb.mxu2 %v3819_v16 }
 0x3ac   :  { %1955 = vmatmul.f32.vlgmr.msrb.gmra.mxu2 %v3817_v18 }
 0x40d   :  { %v1936_v57 = vpop.f32.mrf.mxu1 }
 0x40f   :  { %v1916_v63 = vpop.f32.mrf.mxu2 }
 0x411   :  { %v1876_v43 = vpop.f32.mrf.mxu3 }
 0x419   :  { %v1976_v31 = vpop.f32.mrf.mxu3 }
 0x425   :  { %v1896_v48 = vpop.f32.mrf.mxu0 }
 0x426   :  { %v1897_v19 = vadd.f32 %v1896_v48, %v1876_v43 }
 0x428   :  { %v1917_v25 = vadd.f32 %v1916_v63, %v1897_v19 }
 0x42a   :  { %2013 = vst [vmem:[%s3711_s5 + $0x30] sm:$0xff] %v1917_v25 }
 0x42f   :  { %v1956_v37 = vpop.f32.mrf.mxu2 }
 0x430   :  { %v1957_v60 = vadd.f32 %v1956_v37, %v1936_v57 }
 0x432   :  { %v1977_v51 = vadd.f32 %v1976_v31, %v1957_v60 }
 0x434   :  { %2014 = vst [vmem:[%s3711_s5 + $0x38] sm:$0xff] %v1977_v51 }

</bundles_post_ra>
